<compile_context>
chip_gen: v6e
topology: v6e:2x2x1
jax: 0.10.0
libtpu: 0.0.40
codegen_flags: <defaults>
</compile_context>

<pallas_src>
import jax
import jax.numpy as jnp
from jax import lax
from jax.experimental import pallas as pl
from jax.experimental.pallas import tpu as pltpu

_LANE = 128


def _sdot_kernel(x_ref, y_ref, c_ref, out_ref, min_sc):
    """One (row-tile i, col-tile j) step.

    x_ref: (tn, D) f32   y_ref: (tm, D) f32   c_ref: (1, tm) f32
    out_ref: (tn, 1) f32   min_sc: (tn, 128) f32 lane-dense running min.
    """
    j = pl.program_id(1)

    @pl.when(j == 0)
    def _():
        min_sc[...] = jnp.full_like(min_sc, jnp.inf)

    x = x_ref[...]            # (tn, D)
    y = y_ref[...]            # (tm, D)
    c = c_ref[...]            # (1, tm)   c = 0.5*||y||^2 - psi (fused in wrapper)

    # MXU: X tile @ Y tile^T  -> (tn, tm), f32 accumulate.
    xy = lax.dot_general(x, y, (((1,), (1,)), ((), ())),
                         preferred_element_type=jnp.float32)

    score = c - xy            # (tn, tm)

    # Lane-dense running min: fold the tm axis in 128-wide lane blocks with
    # VPU elementwise mins; only one cross-lane reduce total (in finalize).
    nblk = score.shape[1] // _LANE
    m = score[:, 0:_LANE]
    for k in range(1, nblk):
        m = jnp.minimum(m, score[:, k * _LANE:(k + 1) * _LANE])
    min_sc[...] = jnp.minimum(min_sc[...], m)

    @pl.when(j == pl.num_programs(1) - 1)
    def _():
        # ||x||^2 / 2 is constant across j -> computed once per row tile.
        x2 = jnp.sum(x * x, axis=1, keepdims=True)              # (tn, 1)
        row_min = jnp.min(min_sc[...], axis=1, keepdims=True)   # single XLU reduce
        out_ref[...] = 0.5 * x2 + row_min


def semi_dual_ot_loss(x, y, psi, *, tn=128, tm=1024):
    """x: (N, D) f32, y: (M, D) f32, psi: (M,) f32 -> scalar f32 loss."""
    x = x.astype(jnp.float32)
    y = y.astype(jnp.float32)
    psi = psi.astype(jnp.float32)

    N, D = x.shape
    M, _ = y.shape

    # Clamp tiles to the problem size; keep (8,128) layout constraints.
    tn = min(tn, N)
    tm = min(tm, M)
    assert N % tn == 0 and (tn % 8 == 0 or tn == N), (N, tn)
    assert M % tm == 0 and tm % _LANE == 0, (M, tm)

    # Fuse 0.5*||y||^2 - psi once in the wrapper -> single (1, M) stream.
    c = (0.5 * jnp.sum(y * y, axis=1) - psi).reshape(1, M)

    row_mins = pl.pallas_call(
        _sdot_kernel,
        out_shape=jax.ShapeDtypeStruct((N, 1), jnp.float32),
        grid_spec=pltpu.PrefetchScalarGridSpec(
            num_scalar_prefetch=0,
            grid=(N // tn, M // tm),                        # reduction axis last
            in_specs=[
                pl.BlockSpec((tn, D), lambda i, j: (i, 0)),  # X tile
                pl.BlockSpec((tm, D), lambda i, j: (j, 0)),  # Y tile
                pl.BlockSpec((1, tm), lambda i, j: (0, j)),  # fused 0.5*y2 - psi
            ],
            out_specs=pl.BlockSpec((tn, 1), lambda i, j: (i, 0)),
            scratch_shapes=[pltpu.VMEM((tn, _LANE), jnp.float32)],
        ),
        compiler_params=pltpu.CompilerParams(
            dimension_semantics=("parallel", "arbitrary"),
            vmem_limit_bytes=64 * 1024 * 1024),
    )(x, y, c)

    # Glue: mean over samples + mean of the dual variable.
    return jnp.sum(row_mins) / N + jnp.mean(psi)


def _reference_loss(x, y, psi):
    x = x.astype(jnp.float32)
    y = y.astype(jnp.float32)
    psi = psi.astype(jnp.float32)
    x2 = jnp.sum(x ** 2, axis=1, keepdims=True)             # (N, 1)
    y2 = jnp.sum(y ** 2, axis=1, keepdims=True).T            # (1, M)
    cost = (x2 + y2 - 2.0 * (x @ y.T)) / 2.0                  # (N, M)
    return jnp.mean(jnp.min(cost - psi[None, :], axis=1)) + jnp.mean(psi)


if __name__ == "__main__":
    key = jax.random.PRNGKey(0)
    kx, ky, kp = jax.random.split(key, 3)

    # Small but tile-exercising shapes: 2 row tiles (megacore-friendly on v7x)
    # and 2 reduction tiles along M.
    N, M, D = 256, 2048, 64
    x = jax.random.normal(kx, (N, D), dtype=jnp.float32)
    y = jax.random.normal(ky, (M, D), dtype=jnp.float32)
    # Module __init__ uses psi = zeros; use small random psi to also exercise
    # the dual-variable term.
    psi = 0.1 * jax.random.normal(kp, (M,), dtype=jnp.float32)

    loss = jax.block_until_ready(semi_dual_ot_loss(x, y, psi))
    ref = jax.block_until_ready(_reference_loss(x, y, psi))

    assert jnp.allclose(loss, ref, rtol=1e-5, atol=1e-5), (loss, ref)
    print("KERNEL_OK")
</pallas_src>

<mosaic_0001>
module attributes {stable_mosaic.version = 11 : i64} {
  func.func @_sdot_kernel(%arg0: i32, %arg1: i32, %arg2: memref<128x64xf32, #tpu.memory_space<vmem>>, %arg3: memref<1024x64xf32, #tpu.memory_space<vmem>>, %arg4: memref<1x1024xf32, #tpu.memory_space<vmem>>, %arg5: memref<128x1xf32, #tpu.memory_space<vmem>>, %arg6: memref<128x128xf32, #tpu.memory_space<vmem>>) attributes {dimension_semantics = [#tpu.dimension_semantics<parallel>, #tpu.dimension_semantics<arbitrary>], iteration_bounds = array<i64: 2, 2>, scalar_prefetch = 0 : i64, scratch_operands = 1 : i64, tpu.core_type = #tpu.core_type<tc>, window_params = [{transform_indices = @transform_0, window_bounds = array<i64: 128, 64>}, {transform_indices = @transform_1, window_bounds = array<i64: 1024, 64>}, {transform_indices = @transform_2, window_bounds = array<i64: 1, 1024>}, {transform_indices = @transform_3, window_bounds = array<i64: 128, 1>}]} {
    %c0_i32 = arith.constant 0 : i32
    %0 = arith.cmpi eq, %arg1, %c0_i32 : i32
    %1 = arith.extui %0 : i1 to i32
    %c0_i32_0 = arith.constant 0 : i32
    %2 = arith.cmpi ne, %1, %c0_i32_0 : i32
    scf.if %2 {
      %cst_11 = arith.constant 0x7F800000 : f32
      %30 = vector.broadcast %cst_11 : f32 to vector<128x128xf32>
      %c0_12 = arith.constant 0 : index
      %c0_13 = arith.constant 0 : index
      %31 = vector.load %arg6[%c0_12, %c0_13] : memref<128x128xf32, #tpu.memory_space<vmem>>, vector<128x128xf32>
      tpu.vector_store %arg6[%c0_12, %c0_13], %30 {strides = array<i32>} : memref<128x128xf32, #tpu.memory_space<vmem>>, vector<128x128xf32>,
    } else {
    }
    %c0 = arith.constant 0 : index
    %c0_1 = arith.constant 0 : index
    %3 = vector.load %arg2[%c0, %c0_1] : memref<128x64xf32, #tpu.memory_space<vmem>>, vector<128x64xf32>
    %c0_2 = arith.constant 0 : index
    %c0_3 = arith.constant 0 : index
    %4 = vector.load %arg3[%c0_2, %c0_3] : memref<1024x64xf32, #tpu.memory_space<vmem>>, vector<1024x64xf32>
    %c0_4 = arith.constant 0 : index
    %c0_5 = arith.constant 0 : index
    %5 = vector.load %arg4[%c0_4, %c0_5] : memref<1x1024xf32, #tpu.memory_space<vmem>>, vector<1x1024xf32>
    %cst = arith.constant dense<0.000000e+00> : vector<128x1024xf32>
    %6 = tpu.matmul %3, %4, %cst {dimension_numbers = #tpu.dot_dimension_numbers<[1], [1], [0], [0], [0, 0, 1, 0], [], []>} : vector<128x64xf32>, vector<1024x64xf32>, vector<128x1024xf32> -> vector<128x1024xf32>
    %7 = vector.broadcast %5 : vector<1x1024xf32> to vector<128x1024xf32>
    %8 = arith.subf %7, %6 : vector<128x1024xf32>
    %9 = vector.extract_strided_slice %8 {offsets = [0, 0], sizes = [128, 128], strides = [1, 1]} : vector<128x1024xf32> to vector<128x128xf32>
    %10 = vector.extract_strided_slice %8 {offsets = [0, 128], sizes = [128, 128], strides = [1, 1]} : vector<128x1024xf32> to vector<128x128xf32>
    %11 = arith.minimumf %9, %10 : vector<128x128xf32>
    %12 = vector.extract_strided_slice %8 {offsets = [0, 256], sizes = [128, 128], strides = [1, 1]} : vector<128x1024xf32> to vector<128x128xf32>
    %13 = arith.minimumf %11, %12 : vector<128x128xf32>
    %14 = vector.extract_strided_slice %8 {offsets = [0, 384], sizes = [128, 128], strides = [1, 1]} : vector<128x1024xf32> to vector<128x128xf32>
    %15 = arith.minimumf %13, %14 : vector<128x128xf32>
    %16 = vector.extract_strided_slice %8 {offsets = [0, 512], sizes = [128, 128], strides = [1, 1]} : vector<128x1024xf32> to vector<128x128xf32>
    %17 = arith.minimumf %15, %16 : vector<128x128xf32>
    %18 = vector.extract_strided_slice %8 {offsets = [0, 640], sizes = [128, 128], strides = [1, 1]} : vector<128x1024xf32> to vector<128x128xf32>
    %19 = arith.minimumf %17, %18 : vector<128x128xf32>
    %20 = vector.extract_strided_slice %8 {offsets = [0, 768], sizes = [128, 128], strides = [1, 1]} : vector<128x1024xf32> to vector<128x128xf32>
    %21 = arith.minimumf %19, %20 : vector<128x128xf32>
    %22 = vector.extract_strided_slice %8 {offsets = [0, 896], sizes = [128, 128], strides = [1, 1]} : vector<128x1024xf32> to vector<128x128xf32>
    %23 = arith.minimumf %21, %22 : vector<128x128xf32>
    %c0_6 = arith.constant 0 : index
    %c0_7 = arith.constant 0 : index
    %24 = vector.load %arg6[%c0_6, %c0_7] : memref<128x128xf32, #tpu.memory_space<vmem>>, vector<128x128xf32>
    %25 = arith.minimumf %24, %23 : vector<128x128xf32>
    %c0_8 = arith.constant 0 : index
    %c0_9 = arith.constant 0 : index
    %26 = vector.load %arg6[%c0_8, %c0_9] : memref<128x128xf32, #tpu.memory_space<vmem>>, vector<128x128xf32>
    tpu.vector_store %arg6[%c0_8, %c0_9], %25 {strides = array<i32>} : memref<128x128xf32, #tpu.memory_space<vmem>>, vector<128x128xf32>,
    %c1_i32 = arith.constant 1 : i32
    %27 = arith.cmpi eq, %arg1, %c1_i32 : i32
    %28 = arith.extui %27 : i1 to i32
    %c0_i32_10 = arith.constant 0 : i32
    %29 = arith.cmpi ne, %28, %c0_i32_10 : i32
    scf.if %29 {
      %30 = arith.mulf %3, %3 : vector<128x64xf32>
      %cst_11 = arith.constant dense<0.000000e+00> : vector<128xf32>
      %31 = vector.multi_reduction <add>, %30, %cst_11 [1] : vector<128x64xf32> to vector<128xf32>
      %32 = vector.shape_cast %31 : vector<128xf32> to vector<128x1xf32>
      %c0_12 = arith.constant 0 : index
      %c0_13 = arith.constant 0 : index
      %33 = vector.load %arg6[%c0_12, %c0_13] : memref<128x128xf32, #tpu.memory_space<vmem>>, vector<128x128xf32>
      %cst_14 = arith.constant dense<0x7F800000> : vector<128xf32>
      %34 = vector.multi_reduction <minimumf>, %33, %cst_14 [1] : vector<128x128xf32> to vector<128xf32>
      %35 = vector.shape_cast %34 : vector<128xf32> to vector<128x1xf32>
      %cst_15 = arith.constant 5.000000e-01 : f32
      %36 = vector.broadcast %cst_15 : f32 to vector<128x1xf32>
      %37 = arith.mulf %36, %32 : vector<128x1xf32>
      %38 = arith.addf %37, %35 : vector<128x1xf32>
      %c0_16 = arith.constant 0 : index
      %c0_17 = arith.constant 0 : index
      %39 = vector.load %arg5[%c0_16, %c0_17] : memref<128x1xf32, #tpu.memory_space<vmem>>, vector<128x1xf32>
      tpu.vector_store %arg5[%c0_16, %c0_17], %38 {strides = array<i32>} : memref<128x1xf32, #tpu.memory_space<vmem>>, vector<128x1xf32>,
    } else {
    }
    return
  }
  func.func @transform_0(%arg0: i32, %arg1: i32) -> (i32, i32) {
    %c0_i32 = arith.constant 0 : i32
    %c0_i32_0 = arith.constant 0 : i32
    return %arg0, %c0_i32 : i32, i32
  }
  func.func @transform_1(%arg0: i32, %arg1: i32) -> (i32, i32) {
    %c0_i32 = arith.constant 0 : i32
    %c0_i32_0 = arith.constant 0 : i32
    return %arg1, %c0_i32 : i32, i32
  }
  func.func @transform_2(%arg0: i32, %arg1: i32) -> (i32, i32) {
    %c0_i32 = arith.constant 0 : i32
    %c0_i32_0 = arith.constant 0 : i32
    return %c0_i32, %arg1 : i32, i32
  }
  func.func @transform_3(%arg0: i32, %arg1: i32) -> (i32, i32) {
    %c0_i32 = arith.constant 0 : i32
    %c0_i32_0 = arith.constant 0 : i32
    return %arg0, %c0_i32 : i32, i32
  }
}

</mosaic_0001>

<bundles_post_ra>
// kernel: tpu_custom_call.1
= control target key start
LH: loop header
LB: loop body
LE: loop exit
PB: predicated region body
PF: predicated region fallthrough
CT: control target
= control target key end

     0   :  { %s2618_s12 = smov 0   ;;  %s2620_s13 = smov 0   ;;  %s3671_s0 = inlined_call_operand.vmem [shape: f32[256,64], index: 0, kind: input, shape index: {}]   ;;  %s3672_s1 = inlined_call_operand.vmem [shape: f32[2048,64], index: 1, kind: input, shape index: {}]   ;;  %s3673_s2 = inlined_call_operand.vmem [shape: f32[1,2048], index: 2, kind: input, shape index: {}]   ;;  %s3674_s3 = inlined_call_operand.vmem [shape: f32[256,1], index: 3, kind: output, shape index: {}]  }
   0x1   :  { %s2622_s14 = smov 0   ;;  %s2624_s15 = smov 0  }
   0x2   :  { %s2626_s16 = smov 0  }
   0x3 LB: > { %s22_s17 = sadd.s32 1, %s2587_s14  ;;  %s25_s18 = sadd.s32 1, %s2591_s15  ;;  %s2595_s16 = sphi %s2626_s16, %s13_s16   ;;  %s2591_s15 = sphi %s2624_s15, %s3762_s15   ;;  %s2587_s14 = sphi %s2622_s14, %s3761_s14   ;;  %s2583_s13 = sphi %s2620_s13, %s3760_s13   ;;  %s2579_s12 = sphi %s2618_s12, %s3759_s12  }
   0x4   : > { %p23_p0 = scmp.ge.s32.totalorder %s22_s17, 2  ;;  %p2056_p1 = scmp.ge.s32.totalorder %s2595_s16, 1 }
   0x5   : > { %p171_p2 = scmp.lt.s32.totalorder %s2595_s16, 5 }
   0x6   : > { %s3764_s17 = smov (%p23_p0, %s22_s17), 0  ;;  %s3766_s18 = smov (!%p23_p0, %s25_s18), %s2591_s15 }
   0x7   : > { %p172_p3 = pnand %p2056_p1, %p171_p2  ;;  %p27_p4 = scmp.ge.s32.totalorder %s3766_s18, 2 }
   0x9   : > { %s3768_s18 = smov (%p27_p4, %s3766_s18), 0  ;;  %175 = sbr.rel (%p172_p3) target bundleno = 635 (0x27b), region = 32 }
   0xe   : > { %s2057_s19 = sshll.u32 %s2583_s13, 4  ;;  %s2059_s20 = sshll.u32 %s2579_s12, 7 }
   0xf   : > { %p205_p5 = scmp.lt.s32.totalorder %s2057_s19, 31  ;;  %p211_p6 = scmp.lt.s32.totalorder %s2059_s20, 255 }
  0x10   : > { %s2061_s21 = sshll.u32 %s2579_s12, 3  ;;  %p2064_p8 = scmp.ne.s32.totalorder %s2579_s12, 0 }
  0x11   : > { %s3770_s19 = smov (!%p205_p5, %s2057_s19), 31  ;;  %s3772_s20 = smov (!%p211_p6, %s2059_s20), 255 }
  0x12   : > { %s2058_s22 = sshll.u32 %s3770_s19, 3  ;;  %p217_p7 = scmp.lt.s32.totalorder %s2061_s21, 15 }
  0x13   : > { %s2655_s25 = scalar_lea.vmem %s3671_s0, %s2058_s22  ;;  %s2060_s26 = sshll.u32 %s3772_s20, 3 }
  0x14   : > { %s2660_s29 = scalar_lea.vmem %s3672_s1, %s2060_s26  ;;  %s2665_s5 = scalar_lea.vmem %s3674_s3, %s2058_s22 }
  0x15   : > { %s3774_s21 = smov (!%p217_p7, %s2061_s21), 15  ;;  %230 = sbr.rel (%p2064_p8) target bundleno = 35 (0x23), region = 36 }
  0x16   : > { %s219_s8 = scalar_lea.vmem %s3673_s2, %s3774_s21 }
  0x1a   : > { %v2597_v0 = vmov inf  }
  0x1b   : > { %231 = vst [vmem:[#allocation2 + $0x30] sm:$0xff] %v2597_v0  ;;  %232 = vst [vmem:[#allocation2] sm:$0xff] %v2597_v0 }
  0x1c   : > { %233 = vst [vmem:[#allocation2 + $0x58] sm:$0xff] %v2597_v0  ;;  %234 = vst [vmem:[#allocation2 + $0x18] sm:$0xff] %v2597_v0 }
  0x1d   : > { %235 = vst [vmem:[#allocation2 + $0x50] sm:$0xff] %v2597_v0  ;;  %236 = vst [vmem:[#allocation2 + $0x68] sm:$0xff] %v2597_v0 }
  0x1e   : > { %237 = vst [vmem:[#allocation2 + $0x8] sm:$0xff] %v2597_v0  ;;  %238 = vst [vmem:[#allocation2 + $0x48] sm:$0xff] %v2597_v0 }
  0x1f   : > { %239 = vst [vmem:[#allocation2 + $0x40] sm:$0xff] %v2597_v0  ;;  %240 = vst [vmem:[#allocation2 + $0x20] sm:$0xff] %v2597_v0 }
  0x20   : > { %241 = vst [vmem:[#allocation2 + $0x10] sm:$0xff] %v2597_v0  ;;  %242 = vst [vmem:[#allocation2 + $0x38] sm:$0xff] %v2597_v0 }
  0x21   : > { %243 = vst [vmem:[#allocation2 + $0x60] sm:$0xff] %v2597_v0  ;;  %244 = vst [vmem:[#allocation2 + $0x70] sm:$0xff] %v2597_v0 }
  0x22   : > { %245 = vst [vmem:[#allocation2 + $0x78] sm:$0xff] %v2597_v0  ;;  %246 = vst [vmem:[#allocation2 + $0x28] sm:$0xff] %v2597_v0 }
  0x23 PF: > { %v294_v1 = vld [vmem:[%s2660_s29 + $0xf8] sm:$0xff]  ;;  %vm392_vm0 = vcmask 523264   ;;  %v293_v4 = vld [vmem:[%s2660_s29 + $0xf0] sm:$0xff]  ;;  %v292_v9 = vld [vmem:[%s2660_s29 + $0xe8] sm:$0xff]  ;;  %p2257_p9 = scmp.ne.s32.totalorder %s2579_s12, 1 }
  0x24   : > { %v278_v2 = vld [vmem:[%s2660_s29 + $0x78] sm:$0xff]  ;;  %2260 = vmatprep.subr.msk.mxu0 %vm392_vm0, %v294_v1  ;;  %v325_v6 = vld [vmem:[%s2660_s29 + $0x1f0] sm:$0xff]  ;;  %v324_v10 = vld [vmem:[%s2660_s29 + $0x1e8] sm:$0xff] }
  0x25   : > { %v326_v3 = vld [vmem:[%s2660_s29 + $0x1f8] sm:$0xff]  ;;  %2261 = vmatpush3.xpose.msk.msra.mxu0 %vm392_vm0, %v278_v2  ;;  %v277_v7 = vld [vmem:[%s2660_s29 + $0x70] sm:$0xff]  ;;  %v276_v11 = vld [vmem:[%s2660_s29 + $0x68] sm:$0xff] }
  0x26   : > { %2324 = vmatprep.subr.msk.mxu1 %vm392_vm0, %v326_v3  ;;  %v310_v5 = vld [vmem:[%s2660_s29 + $0x178] sm:$0xff]  ;;  %2262 = vmatprep.subr.msk.mxu0 %vm392_vm0, %v293_v4  ;;  %v309_v8 = vld [vmem:[%s2660_s29 + $0x170] sm:$0xff]  ;;  %v308_v12 = vld [vmem:[%s2660_s29 + $0x168] sm:$0xff] }
  0x27   : > { %2325 = vmatpush3.xpose.msk.msra.mxu1 %vm392_vm0, %v310_v5  ;;  %v291_v13 = vld [vmem:[%s2660_s29 + $0xe0] sm:$0xff]  ;;  %v290_v17 = vld [vmem:[%s2660_s29 + $0xd8] sm:$0xff]  ;;  %v289_v21 = vld [vmem:[%s2660_s29 + $0xd0] sm:$0xff] }
  0x28   : > { %2326 = vmatprep.subr.msk.mxu1 %vm392_vm0, %v325_v6  ;;  %v323_v14 = vld [vmem:[%s2660_s29 + $0x1e0] sm:$0xff]  ;;  %v322_v18 = vld [vmem:[%s2660_s29 + $0x1d8] sm:$0xff]  ;;  %v321_v22 = vld [vmem:[%s2660_s29 + $0x1d0] sm:$0xff] }
  0x29   : > { %2263 = vmatpush3.xpose.msk.msra.mxu0 %vm392_vm0, %v277_v7  ;;  %v275_v15 = vld [vmem:[%s2660_s29 + $0x60] sm:$0xff]  ;;  %v274_v19 = vld [vmem:[%s2660_s29 + $0x58] sm:$0xff]  ;;  %v273_v23 = vld [vmem:[%s2660_s29 + $0x50] sm:$0xff] }
  0x2a   : > { %2264 = vmatprep.subr.msk.mxu0 %vm392_vm0, %v292_v9  ;;  %v307_v16 = vld [vmem:[%s2660_s29 + $0x160] sm:$0xff]  ;;  %v306_v20 = vld [vmem:[%s2660_s29 + $0x158] sm:$0xff]  ;;  %v305_v24 = vld [vmem:[%s2660_s29 + $0x150] sm:$0xff] }
  0x2b   : > { %2327 = vmatpush3.xpose.msk.msra.mxu1 %vm392_vm0, %v309_v8  ;;  %v288_v25 = vld [vmem:[%s2660_s29 + $0xc8] sm:$0xff]  ;;  %v2723_v27 = vld [vmem:[%s2655_s25] sm:$0xff]  ;;  %v286_v34 = vld [vmem:[%s2660_s29 + $0xb8] sm:$0xff] }
  0x2c   : > { %2328 = vmatprep.subr.msk.mxu1 %vm392_vm0, %v324_v10  ;;  %v320_v26 = vld [vmem:[%s2660_s29 + $0x1c8] sm:$0xff]  ;;  %3691 = vst [vmem:[#allocation3_spill] sm:$0xff] %v2723_v27  ;;  %2292 = vmatprep.mubr.msk.f32.mxu0 %vm392_vm0, %v2723_v27  ;;  %v287_v30 = vld [vmem:[%s2660_s29 + $0xc0] sm:$0xff]  ;;  %v318_v35 = vld [vmem:[%s2660_s29 + $0x1b8] sm:$0xff] }
  0x2d   : > { %2265 = vmatpush3.xpose.msk.msra.mxu0 %vm392_vm0, %v276_v11  ;;  %2356 = vmatprep.mubr.msk.f32.mxu1 %vm392_vm0, %v2723_v27  ;;  %v272_v28 = vld [vmem:[%s2660_s29 + $0x48] sm:$0xff]  ;;  %v319_v31 = vld [vmem:[%s2660_s29 + $0x1c0] sm:$0xff]  ;;  %v270_v36 = vld [vmem:[%s2660_s29 + $0x38] sm:$0xff] }
  0x2e   : > { %2266 = vmatprep.subr.msk.mxu0 %vm392_vm0, %v291_v13  ;;  %v304_v29 = vld [vmem:[%s2660_s29 + $0x148] sm:$0xff]  ;;  %v271_v32 = vld [vmem:[%s2660_s29 + $0x40] sm:$0xff]  ;;  %v302_v37 = vld [vmem:[%s2660_s29 + $0x138] sm:$0xff] }
  0x2f   : > { %2329 = vmatpush3.xpose.msk.msra.mxu1 %vm392_vm0, %v308_v12  ;;  %v303_v33 = vld [vmem:[%s2660_s29 + $0x140] sm:$0xff]  ;;  %v285_v38 = vld [vmem:[%s2660_s29 + $0xb0] sm:$0xff]  ;;  %v284_v42 = vld [vmem:[%s2660_s29 + $0xa8] sm:$0xff] }
  0x30   : > { %2330 = vmatprep.subr.msk.mxu1 %vm392_vm0, %v323_v14  ;;  %v317_v39 = vld [vmem:[%s2660_s29 + $0x1b0] sm:$0xff]  ;;  %v316_v43 = vld [vmem:[%s2660_s29 + $0x1a8] sm:$0xff]  ;;  %v283_v46 = vld [vmem:[%s2660_s29 + $0xa0] sm:$0xff] }
  0x31   : > { %2267 = vmatpush3.xpose.msk.msra.mxu0 %vm392_vm0, %v275_v15  ;;  %v269_v40 = vld [vmem:[%s2660_s29 + $0x30] sm:$0xff]  ;;  %v268_v44 = vld [vmem:[%s2660_s29 + $0x28] sm:$0xff]  ;;  %v315_v47 = vld [vmem:[%s2660_s29 + $0x1a0] sm:$0xff] }
  0x32   : > { %2268 = vmatprep.subr.msk.mxu0 %vm392_vm0, %v290_v17  ;;  %v301_v41 = vld [vmem:[%s2660_s29 + $0x130] sm:$0xff]  ;;  %v300_v45 = vld [vmem:[%s2660_s29 + $0x128] sm:$0xff]  ;;  %v267_v48 = vld [vmem:[%s2660_s29 + $0x20] sm:$0xff] }
  0x33   : > { %2331 = vmatpush3.xpose.msk.msra.mxu1 %vm392_vm0, %v307_v16  ;;  %v299_v49 = vld [vmem:[%s2660_s29 + $0x120] sm:$0xff]  ;;  %v282_v50 = vld [vmem:[%s2660_s29 + $0x98] sm:$0xff]  ;;  %v281_v54 = vld [vmem:[%s2660_s29 + $0x90] sm:$0xff] }
  0x34   : > { %2332 = vmatprep.subr.msk.mxu1 %vm392_vm0, %v322_v18  ;;  %v314_v51 = vld [vmem:[%s2660_s29 + $0x198] sm:$0xff]  ;;  %v313_v55 = vld [vmem:[%s2660_s29 + $0x190] sm:$0xff]  ;;  %v280_v58 = vld [vmem:[%s2660_s29 + $0x88] sm:$0xff] }
  0x35   : > { %2269 = vmatpush3.xpose.msk.msra.mxu0 %vm392_vm0, %v274_v19  ;;  %v266_v52 = vld [vmem:[%s2660_s29 + $0x18] sm:$0xff]  ;;  %v265_v56 = vld [vmem:[%s2660_s29 + $0x10] sm:$0xff]  ;;  %v312_v59 = vld [vmem:[%s2660_s29 + $0x188] sm:$0xff] }
  0x36   : > { %2270 = vmatprep.subr.msk.mxu0 %vm392_vm0, %v289_v21  ;;  %v298_v53 = vld [vmem:[%s2660_s29 + $0x118] sm:$0xff]  ;;  %v297_v57 = vld [vmem:[%s2660_s29 + $0x110] sm:$0xff]  ;;  %v264_v60 = vld [vmem:[%s2660_s29 + $0x8] sm:$0xff] }
  0x37   : > { %2333 = vmatpush3.xpose.msk.msra.mxu1 %vm392_vm0, %v306_v20  ;;  %v296_v61 = vld [vmem:[%s2660_s29 + $0x108] sm:$0xff]  ;;  %v279_v62 = vld [vmem:[%s2660_s29 + $0x80] sm:$0xff]  ;;  %v358_v2 = vld [vmem:[%s2660_s29 + $0x2f8] sm:$0xff] }
  0x38   : > { %2334 = vmatprep.subr.msk.mxu1 %vm392_vm0, %v321_v22  ;;  %v311_v63 = vld [vmem:[%s2660_s29 + $0x180] sm:$0xff]  ;;  %v390_v3 = vld [vmem:[%s2660_s29 + $0x3f8] sm:$0xff]  ;;  %v2814_v5 = vld [vmem:[%s2655_s25 + $0x8] sm:$0xff] }
  0x39   : > { %2271 = vmatpush3.xpose.msk.msra.mxu0 %vm392_vm0, %v273_v23  ;;  %v263_v0 = vld [vmem:[%s2660_s29] sm:$0xff]  ;;  %v342_v4 = vld [vmem:[%s2660_s29 + $0x278] sm:$0xff]  ;;  %3692 = vst [vmem:[#allocation4_spill] sm:$0xff] %v2814_v5  ;;  %v357_v6 = vld [vmem:[%s2660_s29 + $0x2f0] sm:$0xff] }
  0x3a   : > { %2272 = vmatprep.subr.msk.mxu0 %vm392_vm0, %v288_v25  ;;  %v295_v1 = vld [vmem:[%s2660_s29 + $0x100] sm:$0xff]  ;;  %v374_v7 = vld [vmem:[%s2660_s29 + $0x378] sm:$0xff]  ;;  %v389_v8 = vld [vmem:[%s2660_s29 + $0x3f0] sm:$0xff] }
  0x3b   : > { %2335 = vmatpush3.xpose.msk.msra.mxu1 %vm392_vm0, %v305_v24  ;;  %v341_v9 = vld [vmem:[%s2660_s29 + $0x270] sm:$0xff]  ;;  %v356_v11 = vld [vmem:[%s2660_s29 + $0x2e8] sm:$0xff]  ;;  %v2850_v15 = vld [vmem:[%s2655_s25 + $0x18] sm:$0xff] }
  0x3c   : > { %2336 = vmatprep.subr.msk.mxu1 %vm392_vm0, %v320_v26  ;;  %v2831_v10 = vld [vmem:[%s2655_s25 + $0x10] sm:$0xff]  ;;  %v388_v13 = vld [vmem:[%s2660_s29 + $0x3e8] sm:$0xff]  ;;  %3694 = vst [vmem:[#allocation6_spill] sm:$0xff] %v2850_v15  ;;  %v355_v16 = vld [vmem:[%s2660_s29 + $0x2e0] sm:$0xff] }
  0x3d   : > { %2273 = vmatpush3.xpose.msk.msra.mxu0 %vm392_vm0, %v272_v28  ;;  %3693 = vst [vmem:[#allocation5_spill] sm:$0xff] %v2831_v10  ;;  %v373_v12 = vld [vmem:[%s2660_s29 + $0x370] sm:$0xff]  ;;  %v340_v14 = vld [vmem:[%s2660_s29 + $0x268] sm:$0xff]  ;;  %v387_v18 = vld [vmem:[%s2660_s29 + $0x3e0] sm:$0xff] }
  0x3e   : > { %2274 = vmatprep.subr.msk.mxu0 %vm392_vm0, %v287_v30  ;;  %v372_v17 = vld [vmem:[%s2660_s29 + $0x368] sm:$0xff]  ;;  %v339_v19 = vld [vmem:[%s2660_s29 + $0x260] sm:$0xff]  ;;  %v354_v21 = vld [vmem:[%s2660_s29 + $0x2d8] sm:$0xff] }
  0x3f   : > { %2337 = vmatpush3.xpose.msk.msra.mxu1 %vm392_vm0, %v304_v29  ;;  %v2869_v20 = vld [vmem:[%s2655_s25 + $0x20] sm:$0xff]  ;;  %v386_v23 = vld [vmem:[%s2660_s29 + $0x3d8] sm:$0xff]  ;;  %v2888_v25 = vld [vmem:[%s2655_s25 + $0x28] sm:$0xff] }
  0x40   : > { %2338 = vmatprep.subr.msk.mxu1 %vm392_vm0, %v319_v31  ;;  %3695 = vst [vmem:[#allocation7_spill] sm:$0xff] %v2869_v20  ;;  %v371_v22 = vld [vmem:[%s2660_s29 + $0x360] sm:$0xff]  ;;  %v338_v24 = vld [vmem:[%s2660_s29 + $0x258] sm:$0xff]  ;;  %3696 = vst [vmem:[#allocation8_spill] sm:$0xff] %v2888_v25 }
  0x41   : > { %2275 = vmatpush3.xpose.msk.msra.mxu0 %vm392_vm0, %v271_v32  ;;  %v353_v26 = vld [vmem:[%s2660_s29 + $0x2d0] sm:$0xff]  ;;  %v370_v28 = vld [vmem:[%s2660_s29 + $0x358] sm:$0xff]  ;;  %v352_v32 = vld [vmem:[%s2660_s29 + $0x2c8] sm:$0xff] }
  0x42   : > { %2276 = vmatprep.subr.msk.mxu0 %vm392_vm0, %v286_v34  ;;  %v385_v29 = vld [vmem:[%s2660_s29 + $0x3d0] sm:$0xff]  ;;  %v384_v34 = vld [vmem:[%s2660_s29 + $0x3c8] sm:$0xff] }
  0x43   : > { %2339 = vmatpush3.xpose.msk.msra.mxu1 %vm392_vm0, %v303_v33  ;;  %v337_v30 = vld [vmem:[%s2660_s29 + $0x250] sm:$0xff] }
  0x44   : > { %2340 = vmatprep.subr.msk.mxu1 %vm392_vm0, %v318_v35  ;;  %v2907_v31 = vld [vmem:[%s2655_s25 + $0x30] sm:$0xff]  ;;  %v336_v35 = vld [vmem:[%s2660_s29 + $0x248] sm:$0xff] }
  0x45   : > { %2277 = vmatpush3.xpose.msk.msra.mxu0 %vm392_vm0, %v270_v36  ;;  %3697 = vst [vmem:[#allocation9_spill] sm:$0xff] %v2907_v31  ;;  %v369_v33 = vld [vmem:[%s2660_s29 + $0x350] sm:$0xff]  ;;  %v2926_v36 = vld [vmem:[%s2655_s25 + $0x38] sm:$0xff] }
  0x46   : > { %2278 = vmatprep.subr.msk.mxu0 %vm392_vm0, %v285_v38  ;;  %3698 = vst [vmem:[#allocation10_spill] sm:$0xff] %v2926_v36  ;;  %v368_v38 = vld [vmem:[%s2660_s29 + $0x348] sm:$0xff] }
  0x47   : > { %2341 = vmatpush3.xpose.msk.msra.mxu1 %vm392_vm0, %v302_v37  ;;  %v351_v37 = vld [vmem:[%s2660_s29 + $0x2c0] sm:$0xff] }
  0x48   : > { %2342 = vmatprep.subr.msk.mxu1 %vm392_vm0, %v317_v39  ;;  %v383_v39 = vld [vmem:[%s2660_s29 + $0x3c0] sm:$0xff] }
  0x49   : > { %2279 = vmatpush3.xpose.msk.msra.mxu0 %vm392_vm0, %v269_v40  ;;  %v335_v40 = vld [vmem:[%s2660_s29 + $0x240] sm:$0xff] }
  0x4a   : > { %2280 = vmatprep.subr.msk.mxu0 %vm392_vm0, %v284_v42  ;;  %v350_v42 = vld [vmem:[%s2660_s29 + $0x2b8] sm:$0xff] }
  0x4b   : > { %2343 = vmatpush3.xpose.msk.msra.mxu1 %vm392_vm0, %v301_v41  ;;  %v2945_v41 = vld [vmem:[%s2655_s25 + $0x40] sm:$0xff] }
  0x4c   : > { %2344 = vmatprep.subr.msk.mxu1 %vm392_vm0, %v316_v43  ;;  %3699 = vst [vmem:[#allocation11_spill] sm:$0xff] %v2945_v41  ;;  %v367_v43 = vld [vmem:[%s2660_s29 + $0x340] sm:$0xff] }
  0x4d   : > { %2281 = vmatpush3.xpose.msk.msra.mxu0 %vm392_vm0, %v268_v44  ;;  %v382_v44 = vld [vmem:[%s2660_s29 + $0x3b8] sm:$0xff] }
  0x4e   : > { %2282 = vmatprep.subr.msk.mxu0 %vm392_vm0, %v283_v46  ;;  %v2964_v46 = vld [vmem:[%s2655_s25 + $0x48] sm:$0xff] }
  0x4f   : > { %2345 = vmatpush3.xpose.msk.msra.mxu1 %vm392_vm0, %v300_v45  ;;  %v334_v45 = vld [vmem:[%s2660_s29 + $0x238] sm:$0xff]  ;;  %3700 = vst [vmem:[#allocation12_spill] sm:$0xff] %v2964_v46 }
  0x50   : > { %2346 = vmatprep.subr.msk.mxu1 %vm392_vm0, %v315_v47  ;;  %v349_v47 = vld [vmem:[%s2660_s29 + $0x2b0] sm:$0xff] }
  0x51   : > { %2283 = vmatpush3.xpose.msk.msra.mxu0 %vm392_vm0, %v267_v48  ;;  %v366_v48 = vld [vmem:[%s2660_s29 + $0x338] sm:$0xff] }
  0x52   : > { %2284 = vmatprep.subr.msk.mxu0 %vm392_vm0, %v282_v50  ;;  %v333_v50 = vld [vmem:[%s2660_s29 + $0x230] sm:$0xff] }
  0x53   : > { %2347 = vmatpush3.xpose.msk.msra.mxu1 %vm392_vm0, %v299_v49  ;;  %v381_v49 = vld [vmem:[%s2660_s29 + $0x3b0] sm:$0xff] }
  0x54   : > { %2348 = vmatprep.subr.msk.mxu1 %vm392_vm0, %v314_v51  ;;  %v2983_v51 = vld [vmem:[%s2655_s25 + $0x50] sm:$0xff] }
  0x55   : > { %2285 = vmatpush3.xpose.msk.msra.mxu0 %vm392_vm0, %v266_v52  ;;  %3701 = vst [vmem:[#allocation13_spill] sm:$0xff] %v2983_v51  ;;  %v348_v52 = vld [vmem:[%s2660_s29 + $0x2a8] sm:$0xff] }
  0x56   : > { %2286 = vmatprep.subr.msk.mxu0 %vm392_vm0, %v281_v54  ;;  %v380_v54 = vld [vmem:[%s2660_s29 + $0x3a8] sm:$0xff] }
  0x57   : > { %2349 = vmatpush3.xpose.msk.msra.mxu1 %vm392_vm0, %v298_v53  ;;  %v365_v53 = vld [vmem:[%s2660_s29 + $0x330] sm:$0xff] }
  0x58   : > { %2350 = vmatprep.subr.msk.mxu1 %vm392_vm0, %v313_v55  ;;  %v332_v55 = vld [vmem:[%s2660_s29 + $0x228] sm:$0xff] }
  0x59   : > { %2287 = vmatpush3.xpose.msk.msra.mxu0 %vm392_vm0, %v265_v56  ;;  %v3002_v56 = vld [vmem:[%s2655_s25 + $0x58] sm:$0xff] }
  0x5a   : > { %2288 = vmatprep.subr.msk.mxu0 %vm392_vm0, %v280_v58  ;;  %3702 = vst [vmem:[#allocation14_spill] sm:$0xff] %v3002_v56  ;;  %v364_v58 = vld [vmem:[%s2660_s29 + $0x328] sm:$0xff] }
  0x5b   : > { %2351 = vmatpush3.xpose.msk.msra.mxu1 %vm392_vm0, %v297_v57  ;;  %v347_v57 = vld [vmem:[%s2660_s29 + $0x2a0] sm:$0xff] }
  0x5c   : > { %2352 = vmatprep.subr.msk.mxu1 %vm392_vm0, %v312_v59  ;;  %v379_v59 = vld [vmem:[%s2660_s29 + $0x3a0] sm:$0xff] }
  0x5d   : > { %2289 = vmatpush3.xpose.msk.msra.mxu0 %vm392_vm0, %v264_v60  ;;  %v331_v60 = vld [vmem:[%s2660_s29 + $0x220] sm:$0xff] }
  0x5e   : > { %2290 = vmatprep.subr.msk.mxu0 %vm392_vm0, %v279_v62  ;;  %v346_v62 = vld [vmem:[%s2660_s29 + $0x298] sm:$0xff] }
  0x5f   : > { %2353 = vmatpush3.xpose.msk.msra.mxu1 %vm392_vm0, %v296_v61  ;;  %v3021_v61 = vld [vmem:[%s2655_s25 + $0x60] sm:$0xff] }
  0x60   : > { %2354 = vmatprep.subr.msk.mxu1 %vm392_vm0, %v311_v63  ;;  %3703 = vst [vmem:[#allocation15_spill] sm:$0xff] %v3021_v61  ;;  %v363_v63 = vld [vmem:[%s2660_s29 + $0x320] sm:$0xff] }
  0x61   : > { %2291 = vmatpush3.xpose.msk.msra.mxu0 %vm392_vm0, %v263_v0  ;;  %v378_v0 = vld [vmem:[%s2660_s29 + $0x398] sm:$0xff] }
  0x62   : > { %2388 = vmatprep.subr.msk.mxu0 %vm392_vm0, %v358_v2  ;;  %v3040_v2 = vld [vmem:[%s2655_s25 + $0x68] sm:$0xff] }
  0x63   : > { %2355 = vmatpush3.xpose.msk.msra.mxu1 %vm392_vm0, %v295_v1  ;;  %v330_v1 = vld [vmem:[%s2660_s29 + $0x218] sm:$0xff]  ;;  %3704 = vst [vmem:[#allocation16_spill] sm:$0xff] %v3040_v2 }
  0x64   : > { %2452 = vmatprep.subr.msk.mxu1 %vm392_vm0, %v390_v3  ;;  %2293 = vmatmul.mubr.msk.f32.vlgmr.msra.gmra.mxu0 %vm392_vm0, %v2723_v27  ;;  %v345_v3 = vld [vmem:[%s2660_s29 + $0x290] sm:$0xff] }
  0x65   : > { %2389 = vmatpush3.xpose.msk.msra.mxu0 %vm392_vm0, %v342_v4  ;;  %2294 = vmatprep.mubr.msk.f32.mxu0 %vm392_vm0, %v2814_v5  ;;  %v362_v4 = vld [vmem:[%s2660_s29 + $0x318] sm:$0xff] }
  0x66   : > { %2357 = vmatmul.mubr.msk.f32.vlgmr.msra.gmra.mxu1 %vm392_vm0, %v2723_v27  ;;  %2390 = vmatprep.subr.msk.mxu0 %vm392_vm0, %v357_v6  ;;  %v377_v6 = vld [vmem:[%s2660_s29 + $0x390] sm:$0xff] }
  0x67   : > { %2453 = vmatpush3.xpose.msk.msra.mxu1 %vm392_vm0, %v374_v7  ;;  %2358 = vmatprep.mubr.msk.f32.mxu1 %vm392_vm0, %v2814_v5  ;;  %v329_v7 = vld [vmem:[%s2660_s29 + $0x210] sm:$0xff] }
  0x68   : > { %2454 = vmatprep.subr.msk.mxu1 %vm392_vm0, %v389_v8  ;;  %2295 = vmatmul.mubr.msk.f32.gmra.mxu0 %vm392_vm0, %v2814_v5  ;;  %v3059_v8 = vld [vmem:[%s2655_s25 + $0x70] sm:$0xff] }
  0x69   : > { %2391 = vmatpush3.xpose.msk.msra.mxu0 %vm392_vm0, %v341_v9  ;;  %2296 = vmatprep.mubr.msk.f32.mxu0 %vm392_vm0, %v2831_v10  ;;  %3705 = vst [vmem:[#allocation17_spill] sm:$0xff] %v3059_v8  ;;  %v344_v9 = vld [vmem:[%s2660_s29 + $0x288] sm:$0xff] }
  0x6a   : > { %2359 = vmatmul.mubr.msk.f32.gmra.mxu1 %vm392_vm0, %v2814_v5  ;;  %2392 = vmatprep.subr.msk.mxu0 %vm392_vm0, %v356_v11  ;;  %v361_v11 = vld [vmem:[%s2660_s29 + $0x310] sm:$0xff] }
  0x6b   : > { %2455 = vmatpush3.xpose.msk.msra.mxu1 %vm392_vm0, %v373_v12  ;;  %2360 = vmatprep.mubr.msk.f32.mxu1 %vm392_vm0, %v2831_v10  ;;  %v376_v12 = vld [vmem:[%s2660_s29 + $0x388] sm:$0xff] }
  0x6c   : > { %2456 = vmatprep.subr.msk.mxu1 %vm392_vm0, %v388_v13  ;;  %2297 = vmatmul.mubr.msk.f32.gmra.mxu0 %vm392_vm0, %v2831_v10  ;;  %v328_v13 = vld [vmem:[%s2660_s29 + $0x208] sm:$0xff] }
  0x6d   : > { %2393 = vmatpush3.xpose.msk.msra.mxu0 %vm392_vm0, %v340_v14  ;;  %2298 = vmatprep.mubr.msk.f32.mxu0 %vm392_vm0, %v2850_v15  ;;  %v3078_v14 = vld [vmem:[%s2655_s25 + $0x78] sm:$0xff] }
  0x6e   : > { %2361 = vmatmul.mubr.msk.f32.gmra.mxu1 %vm392_vm0, %v2831_v10  ;;  %2394 = vmatprep.subr.msk.mxu0 %vm392_vm0, %v355_v16  ;;  %3706 = vst [vmem:[#allocation18_spill] sm:$0xff] %v3078_v14  ;;  %v343_v16 = vld [vmem:[%s2660_s29 + $0x280] sm:$0xff] }
  0x6f   : > { %2457 = vmatpush3.xpose.msk.msra.mxu1 %vm392_vm0, %v372_v17  ;;  %2362 = vmatprep.mubr.msk.f32.mxu1 %vm392_vm0, %v2850_v15  ;;  %v360_v17 = vld [vmem:[%s2660_s29 + $0x308] sm:$0xff] }
  0x70   : > { %2458 = vmatprep.subr.msk.mxu1 %vm392_vm0, %v387_v18  ;;  %2299 = vmatmul.mubr.msk.f32.gmra.mxu0 %vm392_vm0, %v2850_v15  ;;  %v375_v18 = vld [vmem:[%s2660_s29 + $0x380] sm:$0xff] }
  0x71   : > { %2395 = vmatpush3.xpose.msk.msra.mxu0 %vm392_vm0, %v339_v19  ;;  %2300 = vmatprep.mubr.msk.f32.mxu0 %vm392_vm0, %v2869_v20  ;;  %v327_v19 = vld [vmem:[%s2660_s29 + $0x200] sm:$0xff] }
  0x72   : > { %2363 = vmatmul.mubr.msk.f32.gmra.mxu1 %vm392_vm0, %v2850_v15  ;;  %2396 = vmatprep.subr.msk.mxu0 %vm392_vm0, %v354_v21  ;;  %v359_v21 = vld [vmem:[%s2660_s29 + $0x300] sm:$0xff] }
  0x73   : > { %2459 = vmatpush3.xpose.msk.msra.mxu1 %vm392_vm0, %v371_v22  ;;  %2364 = vmatprep.mubr.msk.f32.mxu1 %vm392_vm0, %v2869_v20 }
  0x74   : > { %2460 = vmatprep.subr.msk.mxu1 %vm392_vm0, %v386_v23  ;;  %2301 = vmatmul.mubr.msk.f32.gmra.mxu0 %vm392_vm0, %v2869_v20 }
  0x75   : > { %2397 = vmatpush3.xpose.msk.msra.mxu0 %vm392_vm0, %v338_v24  ;;  %2302 = vmatprep.mubr.msk.f32.mxu0 %vm392_vm0, %v2888_v25 }
  0x76   : > { %2365 = vmatmul.mubr.msk.f32.gmra.mxu1 %vm392_vm0, %v2869_v20  ;;  %2398 = vmatprep.subr.msk.mxu0 %vm392_vm0, %v353_v26 }
  0x77   : > { %2461 = vmatpush3.xpose.msk.msra.mxu1 %vm392_vm0, %v370_v28  ;;  %2366 = vmatprep.mubr.msk.f32.mxu1 %vm392_vm0, %v2888_v25 }
  0x78   : > { %2462 = vmatprep.subr.msk.mxu1 %vm392_vm0, %v385_v29  ;;  %2303 = vmatmul.mubr.msk.f32.gmra.mxu0 %vm392_vm0, %v2888_v25 }
  0x79   : > { %2399 = vmatpush3.xpose.msk.msra.mxu0 %vm392_vm0, %v337_v30  ;;  %2304 = vmatprep.mubr.msk.f32.mxu0 %vm392_vm0, %v2907_v31 }
  0x7a   : > { %2367 = vmatmul.mubr.msk.f32.gmra.mxu1 %vm392_vm0, %v2888_v25  ;;  %2400 = vmatprep.subr.msk.mxu0 %vm392_vm0, %v352_v32 }
  0x7b   : > { %2463 = vmatpush3.xpose.msk.msra.mxu1 %vm392_vm0, %v369_v33  ;;  %2368 = vmatprep.mubr.msk.f32.mxu1 %vm392_vm0, %v2907_v31 }
  0x7c   : > { %2464 = vmatprep.subr.msk.mxu1 %vm392_vm0, %v384_v34  ;;  %2305 = vmatmul.mubr.msk.f32.gmra.mxu0 %vm392_vm0, %v2907_v31 }
  0x7d   : > { %2401 = vmatpush3.xpose.msk.msra.mxu0 %vm392_vm0, %v336_v35  ;;  %2306 = vmatprep.mubr.msk.f32.mxu0 %vm392_vm0, %v2926_v36 }
  0x7e   : > { %2369 = vmatmul.mubr.msk.f32.gmra.mxu1 %vm392_vm0, %v2907_v31  ;;  %2402 = vmatprep.subr.msk.mxu0 %vm392_vm0, %v351_v37 }
  0x7f   : > { %2465 = vmatpush3.xpose.msk.msra.mxu1 %vm392_vm0, %v368_v38  ;;  %2370 = vmatprep.mubr.msk.f32.mxu1 %vm392_vm0, %v2926_v36 }
  0x80   : > { %2466 = vmatprep.subr.msk.mxu1 %vm392_vm0, %v383_v39  ;;  %2307 = vmatmul.mubr.msk.f32.gmra.mxu0 %vm392_vm0, %v2926_v36 }
  0x81   : > { %2403 = vmatpush3.xpose.msk.msra.mxu0 %vm392_vm0, %v335_v40  ;;  %2308 = vmatprep.mubr.msk.f32.mxu0 %vm392_vm0, %v2945_v41 }
  0x82   : > { %2371 = vmatmul.mubr.msk.f32.gmra.mxu1 %vm392_vm0, %v2926_v36  ;;  %2404 = vmatprep.subr.msk.mxu0 %vm392_vm0, %v350_v42 }
  0x83   : > { %2467 = vmatpush3.xpose.msk.msra.mxu1 %vm392_vm0, %v367_v43  ;;  %2372 = vmatprep.mubr.msk.f32.mxu1 %vm392_vm0, %v2945_v41 }
  0x84   : > { %2468 = vmatprep.subr.msk.mxu1 %vm392_vm0, %v382_v44  ;;  %2309 = vmatmul.mubr.msk.f32.gmra.mxu0 %vm392_vm0, %v2945_v41 }
  0x85   : > { %2405 = vmatpush3.xpose.msk.msra.mxu0 %vm392_vm0, %v334_v45  ;;  %2310 = vmatprep.mubr.msk.f32.mxu0 %vm392_vm0, %v2964_v46 }
  0x86   : > { %2373 = vmatmul.mubr.msk.f32.gmra.mxu1 %vm392_vm0, %v2945_v41  ;;  %2406 = vmatprep.subr.msk.mxu0 %vm392_vm0, %v349_v47 }
  0x87   : > { %2469 = vmatpush3.xpose.msk.msra.mxu1 %vm392_vm0, %v366_v48  ;;  %2374 = vmatprep.mubr.msk.f32.mxu1 %vm392_vm0, %v2964_v46 }
  0x88   : > { %2470 = vmatprep.subr.msk.mxu1 %vm392_vm0, %v381_v49  ;;  %2311 = vmatmul.mubr.msk.f32.gmra.mxu0 %vm392_vm0, %v2964_v46 }
  0x89   : > { %2407 = vmatpush3.xpose.msk.msra.mxu0 %vm392_vm0, %v333_v50  ;;  %2312 = vmatprep.mubr.msk.f32.mxu0 %vm392_vm0, %v2983_v51 }
  0x8a   : > { %2375 = vmatmul.mubr.msk.f32.gmra.mxu1 %vm392_vm0, %v2964_v46  ;;  %2408 = vmatprep.subr.msk.mxu0 %vm392_vm0, %v348_v52 }
  0x8b   : > { %2471 = vmatpush3.xpose.msk.msra.mxu1 %vm392_vm0, %v365_v53  ;;  %2376 = vmatprep.mubr.msk.f32.mxu1 %vm392_vm0, %v2983_v51 }
  0x8c   : > { %2472 = vmatprep.subr.msk.mxu1 %vm392_vm0, %v380_v54  ;;  %2313 = vmatmul.mubr.msk.f32.gmra.mxu0 %vm392_vm0, %v2983_v51 }
  0x8d   : > { %2409 = vmatpush3.xpose.msk.msra.mxu0 %vm392_vm0, %v332_v55  ;;  %2314 = vmatprep.mubr.msk.f32.mxu0 %vm392_vm0, %v3002_v56 }
  0x8e   : > { %2377 = vmatmul.mubr.msk.f32.gmra.mxu1 %vm392_vm0, %v2983_v51  ;;  %2410 = vmatprep.subr.msk.mxu0 %vm392_vm0, %v347_v57 }
  0x8f   : > { %2473 = vmatpush3.xpose.msk.msra.mxu1 %vm392_vm0, %v364_v58  ;;  %2378 = vmatprep.mubr.msk.f32.mxu1 %vm392_vm0, %v3002_v56 }
  0x90   : > { %2474 = vmatprep.subr.msk.mxu1 %vm392_vm0, %v379_v59  ;;  %2315 = vmatmul.mubr.msk.f32.gmra.mxu0 %vm392_vm0, %v3002_v56 }
  0x91   : > { %2411 = vmatpush3.xpose.msk.msra.mxu0 %vm392_vm0, %v331_v60  ;;  %2316 = vmatprep.mubr.msk.f32.mxu0 %vm392_vm0, %v3021_v61 }
  0x92   : > { %2379 = vmatmul.mubr.msk.f32.gmra.mxu1 %vm392_vm0, %v3002_v56  ;;  %2412 = vmatprep.subr.msk.mxu0 %vm392_vm0, %v346_v62 }
  0x93   : > { %2475 = vmatpush3.xpose.msk.msra.mxu1 %vm392_vm0, %v363_v63  ;;  %2380 = vmatprep.mubr.msk.f32.mxu1 %vm392_vm0, %v3021_v61 }
  0x94   : > { %2476 = vmatprep.subr.msk.mxu1 %vm392_vm0, %v378_v0  ;;  %2317 = vmatmul.mubr.msk.f32.gmra.mxu0 %vm392_vm0, %v3021_v61 }
  0x95   : > { %2413 = vmatpush3.xpose.msk.msra.mxu0 %vm392_vm0, %v330_v1  ;;  %2318 = vmatprep.mubr.msk.f32.mxu0 %vm392_vm0, %v3040_v2 }
  0x96   : > { %2381 = vmatmul.mubr.msk.f32.gmra.mxu1 %vm392_vm0, %v3021_v61  ;;  %2414 = vmatprep.subr.msk.mxu0 %vm392_vm0, %v345_v3 }
  0x97   : > { %2477 = vmatpush3.xpose.msk.msra.mxu1 %vm392_vm0, %v362_v4  ;;  %2382 = vmatprep.mubr.msk.f32.mxu1 %vm392_vm0, %v3040_v2 }
  0x98   : > { %2478 = vmatprep.subr.msk.mxu1 %vm392_vm0, %v377_v6  ;;  %2319 = vmatmul.mubr.msk.f32.gmra.mxu0 %vm392_vm0, %v3040_v2 }
  0x99   : > { %2415 = vmatpush3.xpose.msk.msra.mxu0 %vm392_vm0, %v329_v7  ;;  %2320 = vmatprep.mubr.msk.f32.mxu0 %vm392_vm0, %v3059_v8 }
  0x9a   : > { %2383 = vmatmul.mubr.msk.f32.gmra.mxu1 %vm392_vm0, %v3040_v2  ;;  %2416 = vmatprep.subr.msk.mxu0 %vm392_vm0, %v344_v9 }
  0x9b   : > { %2479 = vmatpush3.xpose.msk.msra.mxu1 %vm392_vm0, %v361_v11  ;;  %2384 = vmatprep.mubr.msk.f32.mxu1 %vm392_vm0, %v3059_v8  ;;  %v1470_v11 = vlaneseq }
  0x9c   : > { %2480 = vmatprep.subr.msk.mxu1 %vm392_vm0, %v376_v12  ;;  %2321 = vmatmul.mubr.msk.f32.gmra.mxu0 %vm392_vm0, %v3059_v8 }
  0x9d   : > { %2417 = vmatpush3.xpose.msk.msra.mxu0 %vm392_vm0, %v328_v13  ;;  %2322 = vmatprep.mubr.msk.f32.mxu0 %vm392_vm0, %v3078_v14 }
  0x9e   : > { %2385 = vmatmul.mubr.msk.f32.gmra.mxu1 %vm392_vm0, %v3059_v8  ;;  %2418 = vmatprep.subr.msk.mxu0 %vm392_vm0, %v343_v16 }
  0x9f   : > { %2481 = vmatpush3.xpose.msk.msra.mxu1 %vm392_vm0, %v360_v17  ;;  %2386 = vmatprep.mubr.msk.f32.mxu1 %vm392_vm0, %v3078_v14 }
  0xa0   : > { %2482 = vmatprep.subr.msk.mxu1 %vm392_vm0, %v375_v18  ;;  %2323 = vmatmul.mubr.msk.f32.gmra.mxu0 %vm392_vm0, %v3078_v14  ;;  %v1471_v18 = vshrl.u32 %v1470_v11, 7 }
  0xa1   : > { %2419 = vmatpush3.xpose.msk.msra.mxu0 %vm392_vm0, %v327_v19  ;;  %2420 = vmatprep.mubr.msk.f32.mxu0 %vm392_vm0, %v2723_v27 }
  0xa2   : > { %2387 = vmatmul.mubr.msk.f32.gmra.mxu1 %vm392_vm0, %v3078_v14 }
  0xa3   : > { %2483 = vmatpush3.xpose.msk.msra.mxu1 %vm392_vm0, %v359_v21  ;;  %2484 = vmatprep.mubr.msk.f32.mxu1 %vm392_vm0, %v2723_v27 }
  0xa4   : > { %2421 = vmatmul.mubr.msk.f32.vlgmr.msra.gmra.mxu0 %vm392_vm0, %v2723_v27 }
  0xa5   : > { %2422 = vmatprep.mubr.msk.f32.mxu0 %vm392_vm0, %v2814_v5 }
  0xa6   : > { %2485 = vmatmul.mubr.msk.f32.vlgmr.msra.gmra.mxu1 %vm392_vm0, %v2723_v27 }
  0xa7   : > { %2486 = vmatprep.mubr.msk.f32.mxu1 %vm392_vm0, %v2814_v5 }
  0xa8   : > { %2423 = vmatmul.mubr.msk.f32.gmra.mxu0 %vm392_vm0, %v2814_v5 }
  0xa9   : > { %2424 = vmatprep.mubr.msk.f32.mxu0 %vm392_vm0, %v2831_v10 }
  0xaa   : > { %2487 = vmatmul.mubr.msk.f32.gmra.mxu1 %vm392_vm0, %v2814_v5 }
  0xab   : > { %2488 = vmatprep.mubr.msk.f32.mxu1 %vm392_vm0, %v2831_v10 }
  0xac   : > { %2425 = vmatmul.mubr.msk.f32.gmra.mxu0 %vm392_vm0, %v2831_v10 }
  0xad   : > { %2426 = vmatprep.mubr.msk.f32.mxu0 %vm392_vm0, %v2850_v15 }
  0xae   : > { %2489 = vmatmul.mubr.msk.f32.gmra.mxu1 %vm392_vm0, %v2831_v10 }
  0xaf   : > { %2490 = vmatprep.mubr.msk.f32.mxu1 %vm392_vm0, %v2850_v15 }
  0xb0   : > { %2427 = vmatmul.mubr.msk.f32.gmra.mxu0 %vm392_vm0, %v2850_v15 }
  0xb1   : > { %2428 = vmatprep.mubr.msk.f32.mxu0 %vm392_vm0, %v2869_v20 }
  0xb2   : > { %2491 = vmatmul.mubr.msk.f32.gmra.mxu1 %vm392_vm0, %v2850_v15 }
  0xb3   : > { %2492 = vmatprep.mubr.msk.f32.mxu1 %vm392_vm0, %v2869_v20 }
  0xb4   : > { %2429 = vmatmul.mubr.msk.f32.gmra.mxu0 %vm392_vm0, %v2869_v20 }
  0xb5   : > { %2430 = vmatprep.mubr.msk.f32.mxu0 %vm392_vm0, %v2888_v25 }
  0xb6   : > { %2493 = vmatmul.mubr.msk.f32.gmra.mxu1 %vm392_vm0, %v2869_v20 }
  0xb7   : > { %2494 = vmatprep.mubr.msk.f32.mxu1 %vm392_vm0, %v2888_v25 }
  0xb8   : > { %2431 = vmatmul.mubr.msk.f32.gmra.mxu0 %vm392_vm0, %v2888_v25 }
  0xb9   : > { %2432 = vmatprep.mubr.msk.f32.mxu0 %vm392_vm0, %v2907_v31 }
  0xba   : > { %2495 = vmatmul.mubr.msk.f32.gmra.mxu1 %vm392_vm0, %v2888_v25 }
  0xbb   : > { %2496 = vmatprep.mubr.msk.f32.mxu1 %vm392_vm0, %v2907_v31 }
  0xbc   : > { %2433 = vmatmul.mubr.msk.f32.gmra.mxu0 %vm392_vm0, %v2907_v31 }
  0xbd   : > { %2434 = vmatprep.mubr.msk.f32.mxu0 %vm392_vm0, %v2926_v36 }
  0xbe   : > { %2497 = vmatmul.mubr.msk.f32.gmra.mxu1 %vm392_vm0, %v2907_v31 }
  0xbf   : > { %2498 = vmatprep.mubr.msk.f32.mxu1 %vm392_vm0, %v2926_v36 }
  0xc0   : > { %2435 = vmatmul.mubr.msk.f32.gmra.mxu0 %vm392_vm0, %v2926_v36 }
  0xc1   : > { %2436 = vmatprep.mubr.msk.f32.mxu0 %vm392_vm0, %v2945_v41 }
  0xc2   : > { %2499 = vmatmul.mubr.msk.f32.gmra.mxu1 %vm392_vm0, %v2926_v36 }
  0xc3   : > { %2500 = vmatprep.mubr.msk.f32.mxu1 %vm392_vm0, %v2945_v41 }
  0xc4   : > { %2437 = vmatmul.mubr.msk.f32.gmra.mxu0 %vm392_vm0, %v2945_v41 }
  0xc5   : > { %2438 = vmatprep.mubr.msk.f32.mxu0 %vm392_vm0, %v2964_v46 }
  0xc6   : > { %2501 = vmatmul.mubr.msk.f32.gmra.mxu1 %vm392_vm0, %v2945_v41 }
  0xc7   : > { %2502 = vmatprep.mubr.msk.f32.mxu1 %vm392_vm0, %v2964_v46 }
  0xc8   : > { %2439 = vmatmul.mubr.msk.f32.gmra.mxu0 %vm392_vm0, %v2964_v46 }
  0xc9   : > { %2440 = vmatprep.mubr.msk.f32.mxu0 %vm392_vm0, %v2983_v51 }
  0xca   : > { %2503 = vmatmul.mubr.msk.f32.gmra.mxu1 %vm392_vm0, %v2964_v46  ;;  %v1480_v46 = vsub.s32 2, %v1471_v18 }
  0xcb   : > { %2504 = vmatprep.mubr.msk.f32.mxu1 %vm392_vm0, %v2983_v51 }
  0xcc   : > { %2441 = vmatmul.mubr.msk.f32.gmra.mxu0 %vm392_vm0, %v2983_v51 }
  0xcd   : > { %2442 = vmatprep.mubr.msk.f32.mxu0 %vm392_vm0, %v3002_v56 }
  0xce   : > { %2505 = vmatmul.mubr.msk.f32.gmra.mxu1 %vm392_vm0, %v2983_v51  ;;  %v391_v51 = vld [vmem:[%s219_s8] sm:$0xff] }
  0xcf   : > { %2506 = vmatprep.mubr.msk.f32.mxu1 %vm392_vm0, %v3002_v56  ;;  %v3353_v27 = vrot.slane %v391_v51, %v1480_v46 }
  0xd0   : > { %2443 = vmatmul.mubr.msk.f32.gmra.mxu0 %vm392_vm0, %v3002_v56 }
  0xd1   : > { %2444 = vmatprep.mubr.msk.f32.mxu0 %vm392_vm0, %v3021_v61 }
  0xd2   : > { %2507 = vmatmul.mubr.msk.f32.gmra.mxu1 %vm392_vm0, %v3002_v56 }
  0xd3   : > { %2508 = vmatprep.mubr.msk.f32.mxu1 %vm392_vm0, %v3021_v61 }
  0xd4   : > { %2445 = vmatmul.mubr.msk.f32.gmra.mxu0 %vm392_vm0, %v3021_v61 }
  0xd5   : > { %2446 = vmatprep.mubr.msk.f32.mxu0 %vm392_vm0, %v3040_v2 }
  0xd6   : > { %2509 = vmatmul.mubr.msk.f32.gmra.mxu1 %vm392_vm0, %v3021_v61 }
  0xd7   : > { %2510 = vmatprep.mubr.msk.f32.mxu1 %vm392_vm0, %v3040_v2 }
  0xd8   : > { %2447 = vmatmul.mubr.msk.f32.gmra.mxu0 %vm392_vm0, %v3040_v2 }
  0xd9   : > { %2448 = vmatprep.mubr.msk.f32.mxu0 %vm392_vm0, %v3059_v8 }
  0xda   : > { %2511 = vmatmul.mubr.msk.f32.gmra.mxu1 %vm392_vm0, %v3040_v2  ;;  %v1472_v2 = vsub.s32 0, %v1471_v18 }
  0xdb   : > { %2512 = vmatprep.mubr.msk.f32.mxu1 %vm392_vm0, %v3059_v8 }
  0xdc   : > { %2449 = vmatmul.mubr.msk.f32.gmra.mxu0 %vm392_vm0, %v3059_v8  ;;  %v3345_v20 = vrot.slane %v391_v51, %v1472_v2 }
  0xdd   : > { %2450 = vmatprep.mubr.msk.f32.mxu0 %vm392_vm0, %v3078_v14 }
  0xde   : > { %2513 = vmatmul.mubr.msk.f32.gmra.mxu1 %vm392_vm0, %v3059_v8  ;;  %v1476_v8 = vsub.s32 1, %v1471_v18 }
  0xdf   : > { %2514 = vmatprep.mubr.msk.f32.mxu1 %vm392_vm0, %v3078_v14 }
  0xe0   : > { %2451 = vmatmul.mubr.msk.f32.gmra.mxu0 %vm392_vm0, %v3078_v14  ;;  %v3339_v11 = vrot.slane %v391_v51, %v1476_v8 }
  0xe2   : > { %2515 = vmatmul.mubr.msk.f32.gmra.mxu1 %vm392_vm0, %v3078_v14 }
 0x124   : > { %v3234_v22 = vpop.f32.mrf.mxu0 }
 0x126   : > { %v3236_v23 = vpop.f32.mrf.mxu1  ;;  %v3238_v24 = vpop.f32.mrf.mxu0 }
 0x127   : > { %v1511_v15 = vsub.f32 %v3339_v11, %v3238_v24  ;;  %v1512_v46 = vsub.f32 %v3353_v27, %v3236_v23  ;;  %v1488_v24 = vsub.s32 4, %v1471_v18 }
 0x128   : > { %v3240_v26 = vpop.f32.mrf.mxu1  ;;  %v3242_v28 = vpop.f32.mrf.mxu0 }
 0x12a   : > { %v3244_v29 = vpop.f32.mrf.mxu1  ;;  %v3246_v30 = vpop.f32.mrf.mxu0 }
 0x12b   : > { %v1519_v2 = vsub.f32 %v3339_v11, %v3246_v30  ;;  %v1496_v30 = vsub.s32 6, %v1471_v18 }
 0x12c   : > { %v3248_v32 = vpop.f32.mrf.mxu1  ;;  %v3250_v33 = vpop.f32.mrf.mxu0 }
 0x12e   : > { %v3252_v34 = vpop.f32.mrf.mxu1  ;;  %v3254_v35 = vpop.f32.mrf.mxu0 }
 0x130   : > { %v3256_v37 = vpop.f32.mrf.mxu1  ;;  %v3258_v38 = vpop.f32.mrf.mxu0 }
 0x132   : > { %v3260_v39 = vpop.f32.mrf.mxu1  ;;  %v3262_v40 = vpop.f32.mrf.mxu0 }
 0x134   : > { %v3264_v42 = vpop.f32.mrf.mxu1  ;;  %v3266_v43 = vpop.f32.mrf.mxu0 }
 0x136   : > { %v3268_v44 = vpop.f32.mrf.mxu1  ;;  %v3270_v45 = vpop.f32.mrf.mxu0 }
 0x138   : > { %v3272_v47 = vpop.f32.mrf.mxu1  ;;  %v3274_v48 = vpop.f32.mrf.mxu0 }
 0x13a   : > { %v3276_v49 = vpop.f32.mrf.mxu1  ;;  %v3278_v50 = vpop.f32.mrf.mxu0 }
 0x13c   : > { %v3280_v52 = vpop.f32.mrf.mxu1  ;;  %v3282_v53 = vpop.f32.mrf.mxu0 }
 0x13e   : > { %v3284_v54 = vpop.f32.mrf.mxu1  ;;  %v3286_v55 = vpop.f32.mrf.mxu0 }
 0x140   : > { %v3288_v57 = vpop.f32.mrf.mxu1  ;;  %v3290_v58 = vpop.f32.mrf.mxu0 }
 0x142   : > { %v3292_v59 = vpop.f32.mrf.mxu1  ;;  %v3294_v60 = vpop.f32.mrf.mxu0 }
 0x144   : > { %v3296_v62 = vpop.f32.mrf.mxu1  ;;  %v3298_v63 = vpop.f32.mrf.mxu0 }
 0x146   : > { %v3300_v0 = vpop.f32.mrf.mxu1  ;;  %v3302_v1 = vpop.f32.mrf.mxu0 }
 0x148   : > { %v3304_v3 = vpop.f32.mrf.mxu1  ;;  %v3306_v4 = vpop.f32.mrf.mxu0 }
 0x14a   : > { %v3308_v6 = vpop.f32.mrf.mxu1  ;;  %v3310_v7 = vpop.f32.mrf.mxu0 }
 0x14c   : > { %v3312_v9 = vpop.f32.mrf.mxu1  ;;  %v3314_v12 = vpop.f32.mrf.mxu0 }
 0x14e   : > { %v3316_v13 = vpop.f32.mrf.mxu1  ;;  %v3318_v16 = vpop.f32.mrf.mxu0 }
 0x150   : > { %v3320_v17 = vpop.f32.mrf.mxu1  ;;  %v3322_v19 = vpop.f32.mrf.mxu0 }
 0x151   : > { %3707 = vst [vmem:[#allocation19_spill] sm:$0xff] %v3320_v17  ;;  %v1492_v17 = vsub.s32 5, %v1471_v18 }
 0x152   : > { %v3324_v21 = vpop.f32.mrf.mxu1  ;;  %v3326_v14 = vpop.f32.mrf.mxu0 }
 0x154   : > { %v3328_v61 = vpop.f32.mrf.mxu1  ;;  %v3335_v56 = vpop.f32.mrf.mxu0 }
 0x155   : > { %3708 = vst [vmem:[#allocation20_spill] sm:$0xff] %v3328_v61  ;;  %3709 = vst [vmem:[#allocation21_spill] sm:$0xff] %v3335_v56  ;;  %v1510_v61 = vsub.f32 %v3345_v20, %v3234_v22 }
 0x156   : > { %v3337_v41 = vpop.f32.mrf.mxu1  ;;  %v3341_v31 = vpop.f32.mrf.mxu0 }
 0x157   : > { %3710 = vst [vmem:[#allocation22_spill] sm:$0xff] %v3337_v41  ;;  %3711 = vst [vmem:[#allocation23_spill] sm:$0xff] %v3341_v31  ;;  %v1484_v41 = vsub.s32 3, %v1471_v18 }
 0x158   : > { %v3343_v36 = vpop.f32.mrf.mxu1  ;;  %v3347_v25 = vpop.f32.mrf.mxu0 }
 0x159   : > { %3712 = vst [vmem:[#allocation24_spill] sm:$0xff] %v3343_v36  ;;  %3713 = vst [vmem:[#allocation25_spill] sm:$0xff] %v3347_v25  ;;  %v3375_v22 = vrot.slane %v391_v51, %v1484_v41  ;;  %v1526_v41 = vsub.f32 %v3345_v20, %v3250_v33  ;;  %v1535_v33 = vsub.f32 %v3339_v11, %v3262_v40 }
 0x15a   : > { %v3349_v5 = vpop.f32.mrf.mxu1  ;;  %v3355_v10 = vpop.f32.mrf.mxu0 }
 0x15b   : > { %3714 = vst [vmem:[#allocation26_spill] sm:$0xff] %v3349_v5  ;;  %3715 = vst [vmem:[#allocation27_spill] sm:$0xff] %v3355_v10  ;;  %v1638_v5 = vmin.f32 %v1510_v61, %v1511_v15  ;;  %v1518_v10 = vsub.f32 %v3345_v20, %v3242_v28  ;;  %v1527_v15 = vsub.f32 %v3339_v11, %v3254_v35 }
 0x15c   : > { %v3357_v8 = vpop.f32.mrf.mxu1  ;;  %v3363_v36 = vpop.f32.mrf.mxu0  ;;  %v3397_v35 = vrot.slane %v391_v51, %v1496_v30 }
 0x15d   : > { %3716 = vst [vmem:[#allocation28_spill] sm:$0xff] %v3357_v8  ;;  %3717 = vst [vmem:[#allocation29_spill] sm:$0xff] %v3363_v36  ;;  %v1639_v31 = vmin.f32 %v1518_v10, %v1519_v2  ;;  %v1654_v28 = vmin.f32 %v1638_v5, %v1512_v46  ;;  %v3385_v36 = vrot.slane %v391_v51, %v1488_v24  ;;  %v1500_v10 = vsub.s32 7, %v1471_v18 }
 0x15e   : > { %v3365_v25 = vpop.f32.mrf.mxu1  ;;  %v3371_v8 = vpop.f32.mrf.mxu0  ;;  %v3395_v2 = vrot.slane %v391_v51, %v1492_v17  ;;  %v1528_v5 = vsub.f32 %v3353_v27, %v3252_v34 }
 0x15f   : > { %3718 = vst [vmem:[#allocation30_spill] sm:$0xff] %v3365_v25  ;;  %3719 = vst [vmem:[#allocation31_spill] sm:$0xff] %v3371_v8  ;;  %v1520_v25 = vsub.f32 %v3353_v27, %v3244_v29  ;;  %v1513_v29 = vsub.f32 %v3375_v22, %v3240_v26  ;;  %v1521_v26 = vsub.f32 %v3375_v22, %v3248_v32 }
 0x160   : > { %v3373_v56 = vpop.f32.mrf.mxu1  ;;  %v3381_v61 = vpop.f32.mrf.mxu0 }
 0x161   : > { %3720 = vst [vmem:[#allocation32_spill] sm:$0xff] %v3373_v56  ;;  %3721 = vst [vmem:[#allocation33_spill] sm:$0xff] %v3381_v61  ;;  %v1655_v61 = vmin.f32 %v1639_v31, %v1520_v25  ;;  %v1670_v24 = vmin.f32 %v1654_v28, %v1513_v29  ;;  %v1534_v25 = vsub.f32 %v3345_v20, %v3258_v38 }
 0x162   : > { %v3383_v23 = vpop.f32.mrf.mxu1  ;;  %v3389_v56 = vpop.f32.mrf.mxu0 }
 0x163   : > { %3722 = vst [vmem:[#allocation34_spill] sm:$0xff] %v3383_v23  ;;  %3723 = vst [vmem:[#allocation35_spill] sm:$0xff] %v3389_v56  ;;  %v1640_v23 = vmin.f32 %v1526_v41, %v1527_v15  ;;  %v3406_v56 = vrot.slane %v391_v51, %v1500_v10  ;;  %v1671_v28 = vmin.f32 %v1655_v61, %v1521_v26 }
 0x164   : > { %v3391_v8 = vpop.f32.mrf.mxu1  ;;  %v1213_v46 = vpop.f32.mrf.mxu0  ;;  %v1543_v41 = vsub.f32 %v3339_v11, %v3270_v45  ;;  %v1536_v51 = vsub.f32 %v3353_v27, %v3260_v39 }
 0x165   : > { %3724 = vst [vmem:[#allocation36_spill] sm:$0xff] %v3391_v8  ;;  %v1514_v8 = vsub.f32 %v3385_v36, %v1213_v46  ;;  %v1656_v40 = vmin.f32 %v1640_v23, %v1528_v5  ;;  %v1641_v46 = vmin.f32 %v1534_v25, %v1535_v33  ;;  %v1544_v25 = vsub.f32 %v3353_v27, %v3268_v44 }
 0x166   : > { %v1374_v18 = vpop.f32.mrf.mxu1  ;;  %v1215_v17 = vpop.f32.mrf.mxu0 }
 0x167   : > { %v1686_v31 = vmin.f32 %v1670_v24, %v1514_v8  ;;  %v1515_v34 = vsub.f32 %v3395_v2, %v1215_v17  ;;  %v1516_v30 = vsub.f32 %v3397_v35, %v1374_v18  ;;  %v1529_v8 = vsub.f32 %v3375_v22, %v3256_v37 }
 0x168   : > { %v1376_v15 = vpop.f32.mrf.mxu1  ;;  %v1219_v29 = vpop.f32.mrf.mxu0  ;;  %v1542_v24 = vsub.f32 %v3345_v20, %v3266_v43  ;;  %v1551_v37 = vsub.f32 %v3339_v11, %v3278_v50 }
 0x169   : > { %v1702_v32 = vmin.f32 %v1686_v31, %v1515_v34  ;;  %v1522_v10 = vsub.f32 %v3385_v36, %v1219_v29  ;;  %v1517_v61 = vsub.f32 %v3406_v56, %v1376_v15  ;;  %v1672_v26 = vmin.f32 %v1656_v40, %v1529_v8  ;;  %v1750_v31 = vld [vmem:[#allocation2 + $0x30] sm:$0xff] }
 0x16a   : > { %v1380_v38 = vpop.f32.mrf.mxu1  ;;  %v1221_v23 = vpop.f32.mrf.mxu0  ;;  %v1642_v17 = vmin.f32 %v1542_v24, %v1543_v41  ;;  %v1657_v34 = vmin.f32 %v1641_v46, %v1536_v51  ;;  %v1550_v40 = vsub.f32 %v3345_v20, %v3274_v48  ;;  %v1751_v48 = vld [vmem:[#allocation2] sm:$0xff] }
 0x16b   : > { %v1718_v5 = vmin.f32 %v1702_v32, %v1516_v30  ;;  %v1687_v45 = vmin.f32 %v1671_v28, %v1522_v10  ;;  %v1523_v33 = vsub.f32 %v3395_v2, %v1221_v23  ;;  %v1524_v18 = vsub.f32 %v3397_v35, %v1380_v38 }
 0x16c   : > { %v1382_v39 = vpop.f32.mrf.mxu1  ;;  %v1225_v43 = vpop.f32.mrf.mxu0  ;;  %v1537_v32 = vsub.f32 %v3375_v22, %v3264_v42  ;;  %v1658_v24 = vmin.f32 %v1642_v17, %v1544_v25  ;;  %v1552_v23 = vsub.f32 %v3353_v27, %v3276_v49  ;;  %v1559_v42 = vsub.f32 %v3339_v11, %v3286_v55 }
 0x16d   : > { %v1734_v15 = vmin.f32 %v1718_v5, %v1517_v61  ;;  %v1703_v29 = vmin.f32 %v1687_v45, %v1523_v33  ;;  %v1530_v30 = vsub.f32 %v3385_v36, %v1225_v43  ;;  %v1525_v41 = vsub.f32 %v3406_v56, %v1382_v39 }
 0x16e   : > { %v1386_v28 = vpop.f32.mrf.mxu1  ;;  %v1227_v44 = vpop.f32.mrf.mxu0  ;;  %v1643_v61 = vmin.f32 %v1550_v40, %v1551_v37  ;;  %v1673_v45 = vmin.f32 %v1657_v34, %v1537_v32  ;;  %v1558_v17 = vsub.f32 %v3345_v20, %v3282_v53  ;;  %v1752_v40 = vld [vmem:[#allocation2 + $0x58] sm:$0xff]  ;;  %v1567_v53 = vsub.f32 %v3339_v11, %v3294_v60 }
 0x16f   : > { %v1532_v10 = vsub.f32 %v3397_v35, %v1386_v28  ;;  %v1766_v50 = vmin.f32 %v1750_v31, %v1734_v15  ;;  %v1719_v38 = vmin.f32 %v1703_v29, %v1524_v18  ;;  %v1688_v8 = vmin.f32 %v1672_v26, %v1530_v30 }
 0x170   : > { %v1531_v46 = vsub.f32 %v3395_v2, %v1227_v44  ;;  %v1388_v51 = vpop.f32.mrf.mxu1  ;;  %v1231_v5 = vpop.f32.mrf.mxu0  ;;  %v1545_v31 = vsub.f32 %v3375_v22, %v3272_v47  ;;  %v1659_v28 = vmin.f32 %v1643_v61, %v1552_v23  ;;  %v1644_v32 = vmin.f32 %v1558_v17, %v1559_v42 }
 0x171   : > { %1782 = vst [vmem:[#allocation2 + $0x30] sm:$0xff] %v1766_v50  ;;  %v1735_v33 = vmin.f32 %v1719_v38, %v1525_v41  ;;  %v1538_v18 = vsub.f32 %v3385_v36, %v1231_v5  ;;  %v1533_v49 = vsub.f32 %v3406_v56, %v1388_v51  ;;  %v1560_v47 = vsub.f32 %v3353_v27, %v3284_v54 }
 0x172   : > { %v1704_v39 = vmin.f32 %v1688_v8, %v1531_v46  ;;  %v1392_v26 = vpop.f32.mrf.mxu1  ;;  %v1233_v25 = vpop.f32.mrf.mxu0  ;;  %v1674_v30 = vmin.f32 %v1658_v24, %v1545_v31  ;;  %v1553_v8 = vsub.f32 %v3375_v22, %v3280_v52  ;;  %v1566_v46 = vsub.f32 %v3345_v20, %v3290_v58  ;;  %v1753_v58 = vld [vmem:[#allocation2 + $0x18] sm:$0xff] }
 0x173   : > { %v1540_v55 = vsub.f32 %v3397_v35, %v1392_v26  ;;  %v1767_v37 = vmin.f32 %v1751_v48, %v1735_v33  ;;  %v1689_v34 = vmin.f32 %v1673_v45, %v1538_v18  ;;  %v1539_v15 = vsub.f32 %v3395_v2, %v1233_v25 }
 0x174   : > { %v1720_v43 = vmin.f32 %v1704_v39, %v1532_v10  ;;  %v1394_v29 = vpop.f32.mrf.mxu1  ;;  %v1237_v41 = vpop.f32.mrf.mxu0  ;;  %v1675_v5 = vmin.f32 %v1659_v28, %v1553_v8  ;;  %v1660_v45 = vmin.f32 %v1644_v32, %v1560_v47  ;;  %v1568_v33 = vsub.f32 %v3353_v27, %v3292_v59 }
 0x175   : > { %1783 = vst [vmem:[#allocation2] sm:$0xff] %v1767_v37  ;;  %v1705_v50 = vmin.f32 %v1689_v34, %v1539_v15  ;;  %v1546_v10 = vsub.f32 %v3385_v36, %v1237_v41  ;;  %v1541_v51 = vsub.f32 %v3406_v56, %v1394_v29  ;;  %v1575_v52 = vsub.f32 %v3339_v11, %v3302_v1 }
 0x176   : > { %v1736_v44 = vmin.f32 %v1720_v43, %v1533_v49  ;;  %v1398_v38 = vpop.f32.mrf.mxu1  ;;  %v1239_v54 = vpop.f32.mrf.mxu0  ;;  %v1645_v18 = vmin.f32 %v1566_v46, %v1567_v53  ;;  %v1561_v25 = vsub.f32 %v3375_v22, %v3288_v57  ;;  %v1576_v47 = vsub.f32 %v3353_v27, %v3300_v0 }
 0x177   : > { %v1548_v24 = vsub.f32 %v3397_v35, %v1398_v38  ;;  %v1721_v23 = vmin.f32 %v1705_v50, %v1540_v55  ;;  %v1690_v60 = vmin.f32 %v1674_v30, %v1546_v10  ;;  %v1547_v42 = vsub.f32 %v3395_v2, %v1239_v54 }
 0x178   : > { %v1768_v61 = vmin.f32 %v1752_v40, %v1736_v44  ;;  %v1400_v48 = vpop.f32.mrf.mxu1  ;;  %v1243_v39 = vpop.f32.mrf.mxu0  ;;  %v1574_v55 = vsub.f32 %v3345_v20, %v3298_v63  ;;  %v1676_v28 = vmin.f32 %v1660_v45, %v1561_v25  ;;  %v1583_v57 = vsub.f32 %v3339_v11, %v3310_v7  ;;  %v1754_v63 = vld [vmem:[#allocation2 + $0x50] sm:$0xff] }
 0x179   : > { %v1737_v26 = vmin.f32 %v1721_v23, %v1541_v51  ;;  %v1706_v31 = vmin.f32 %v1690_v60, %v1547_v42  ;;  %v1554_v17 = vsub.f32 %v3385_v36, %v1243_v39  ;;  %v1549_v59 = vsub.f32 %v3406_v56, %v1400_v48 }
 0x17a   : > { %1784 = vst [vmem:[#allocation2 + $0x58] sm:$0xff] %v1768_v61  ;;  %v1404_v49 = vpop.f32.mrf.mxu1  ;;  %v1245_v37 = vpop.f32.mrf.mxu0  ;;  %v1646_v32 = vmin.f32 %v1574_v55, %v1575_v52  ;;  %v1661_v41 = vmin.f32 %v1645_v18, %v1568_v33  ;;  %v1569_v38 = vsub.f32 %v3375_v22, %v3296_v62  ;;  %v1582_v8 = vsub.f32 %v3345_v20, %v3306_v4  ;;  %v1755_v4 = vld [vmem:[#allocation2 + $0x68] sm:$0xff] }
 0x17b   : > { %v1556_v1 = vsub.f32 %v3397_v35, %v1404_v49  ;;  %v1769_v43 = vmin.f32 %v1753_v58, %v1737_v26  ;;  %v1722_v34 = vmin.f32 %v1706_v31, %v1548_v24  ;;  %v1691_v15 = vmin.f32 %v1675_v5, %v1554_v17 }
 0x17c   : > { %v1555_v29 = vsub.f32 %v3395_v2, %v1245_v37  ;;  %v1406_v30 = vpop.f32.mrf.mxu1  ;;  %v1249_v40 = vpop.f32.mrf.mxu0  ;;  %v1662_v60 = vmin.f32 %v1646_v32, %v1576_v47  ;;  %v1647_v42 = vmin.f32 %v1582_v8, %v1583_v57  ;;  %v1584_v48 = vsub.f32 %v3353_v27, %v3308_v6 }
 0x17d   : > { %1785 = vst [vmem:[#allocation2 + $0x18] sm:$0xff] %v1769_v43  ;;  %v1738_v53 = vmin.f32 %v1722_v34, %v1549_v59  ;;  %v1562_v50 = vsub.f32 %v3385_v36, %v1249_v40  ;;  %v1557_v0 = vsub.f32 %v3406_v56, %v1406_v30  ;;  %v1591_v62 = vsub.f32 %v3339_v11, %v3318_v16  ;;  %v1756_v34 = vld [vmem:[#allocation2 + $0x8] sm:$0xff] }
 0x17e   : > { %v1707_v44 = vmin.f32 %v1691_v15, %v1555_v29  ;;  %v1410_v10 = vpop.f32.mrf.mxu1  ;;  %v1251_v46 = vpop.f32.mrf.mxu0  ;;  %v1677_v45 = vmin.f32 %v1661_v41, %v1569_v38  ;;  %v1577_v18 = vsub.f32 %v3375_v22, %v3304_v3  ;;  %v1590_v26 = vsub.f32 %v3345_v20, %v3314_v12 }
 0x17f   : > { %v1564_v7 = vsub.f32 %v3397_v35, %v1410_v10  ;;  %v1770_v51 = vmin.f32 %v1754_v63, %v1738_v53  ;;  %v1692_v24 = vmin.f32 %v1676_v28, %v1562_v50  ;;  %v1563_v61 = vsub.f32 %v3395_v2, %v1251_v46 }
 0x180   : > { %v1723_v54 = vmin.f32 %v1707_v44, %v1556_v1  ;;  %v1412_v23 = vpop.f32.mrf.mxu1  ;;  %v1255_v5 = vpop.f32.mrf.mxu0  ;;  %v1678_v37 = vmin.f32 %v1662_v60, %v1577_v18  ;;  %v1663_v1 = vmin.f32 %v1647_v42, %v1584_v48  ;;  %v1648_v43 = vmin.f32 %v1590_v26, %v1591_v62  ;;  %v3727_v42 = vld [vmem:[#allocation21_spill] sm:$0xff]  ;;  %v3728_v26 = vld [vmem:[#allocation22_spill] sm:$0xff] }
 0x181   : > { %1786 = vst [vmem:[#allocation2 + $0x50] sm:$0xff] %v1770_v51  ;;  %v1708_v52 = vmin.f32 %v1692_v24, %v1563_v61  ;;  %v1570_v58 = vsub.f32 %v3385_v36, %v1255_v5  ;;  %v1565_v6 = vsub.f32 %v3406_v56, %v1412_v23  ;;  %v1592_v3 = vsub.f32 %v3353_v27, %v3316_v13  ;;  %v3726_v23 = vld [vmem:[#allocation19_spill] sm:$0xff] }
 0x182   : > { %v1739_v33 = vmin.f32 %v1723_v54, %v1557_v0  ;;  %v1416_v39 = vpop.f32.mrf.mxu1  ;;  %v1257_v31 = vpop.f32.mrf.mxu0  ;;  %v1599_v12 = vsub.f32 %v3339_v11, %v3326_v14  ;;  %v1585_v47 = vsub.f32 %v3375_v22, %v3312_v9  ;;  %v1598_v57 = vsub.f32 %v3345_v20, %v3322_v19  ;;  %v3725_v9 = vld [vmem:[#allocation23_spill] sm:$0xff]  ;;  %v1757_v19 = vld [vmem:[#allocation2 + $0x48] sm:$0xff] }
 0x183   : > { %v1572_v16 = vsub.f32 %v3397_v35, %v1416_v39  ;;  %v1724_v49 = vmin.f32 %v1708_v52, %v1564_v7  ;;  %v1693_v25 = vmin.f32 %v1677_v45, %v1570_v58  ;;  %v1571_v55 = vsub.f32 %v3395_v2, %v1257_v31  ;;  %v3729_v31 = vld [vmem:[#allocation27_spill] sm:$0xff] }
 0x184   : > { %v1771_v17 = vmin.f32 %v1755_v4, %v1739_v33  ;;  %v1418_v59 = vpop.f32.mrf.mxu1  ;;  %v1261_v15 = vpop.f32.mrf.mxu0  ;;  %v1679_v10 = vmin.f32 %v1663_v1, %v1585_v47  ;;  %v1664_v38 = vmin.f32 %v1648_v43, %v1592_v3  ;;  %v1600_v8 = vsub.f32 %v3353_v27, %v3324_v21  ;;  %v3730_v43 = vld [vmem:[#allocation20_spill] sm:$0xff] }
 0x185   : > { %v1740_v29 = vmin.f32 %v1724_v49, %v1565_v6  ;;  %v1709_v30 = vmin.f32 %v1693_v25, %v1571_v55  ;;  %v1578_v28 = vsub.f32 %v3385_v36, %v1261_v15  ;;  %v1573_v63 = vsub.f32 %v3406_v56, %v1418_v59 }
 0x186   : > { %1787 = vst [vmem:[#allocation2 + $0x68] sm:$0xff] %v1771_v17  ;;  %v1422_v32 = vpop.f32.mrf.mxu1  ;;  %v1263_v13 = vpop.f32.mrf.mxu0  ;;  %v1607_v0 = vsub.f32 %v3339_v11, %v3725_v9  ;;  %v1649_v7 = vmin.f32 %v1598_v57, %v1599_v12  ;;  %v1593_v60 = vsub.f32 %v3375_v22, %v3726_v23  ;;  %v1606_v48 = vsub.f32 %v3345_v20, %v3727_v42  ;;  %v1758_v17 = vld [vmem:[#allocation2 + $0x40] sm:$0xff] }
 0x187   : > { %v1580_v40 = vsub.f32 %v3397_v35, %v1422_v32  ;;  %v1772_v41 = vmin.f32 %v1756_v34, %v1740_v29  ;;  %v1725_v53 = vmin.f32 %v1709_v30, %v1572_v16  ;;  %v1694_v14 = vmin.f32 %v1678_v37, %v1578_v28  ;;  %v3731_v34 = vld [vmem:[#allocation25_spill] sm:$0xff] }
 0x188   : > { %v1579_v44 = vsub.f32 %v3395_v2, %v1263_v13  ;;  %v1424_v50 = vpop.f32.mrf.mxu1  ;;  %v1267_v46 = vpop.f32.mrf.mxu0  ;;  %v1680_v39 = vmin.f32 %v1664_v38, %v1593_v60  ;;  %v1650_v18 = vmin.f32 %v1606_v48, %v1607_v0  ;;  %v1608_v6 = vsub.f32 %v3353_v27, %v3728_v26 }
 0x189   : > { %1788 = vst [vmem:[#allocation2 + $0x8] sm:$0xff] %v1772_v41  ;;  %v1741_v51 = vmin.f32 %v1725_v53, %v1573_v63  ;;  %v1586_v24 = vsub.f32 %v3385_v36, %v1267_v46  ;;  %v1581_v21 = vsub.f32 %v3406_v56, %v1424_v50  ;;  %v1615_v16 = vsub.f32 %v3339_v11, %v3729_v31  ;;  %v3732_v41 = vld [vmem:[#allocation26_spill] sm:$0xff]  ;;  %v1759_v50 = vld [vmem:[#allocation2 + $0x20] sm:$0xff]  ;;  %v3734_v46 = vld [vmem:[#allocation24_spill] sm:$0xff] }
 0x18a   : > { %v1710_v54 = vmin.f32 %v1694_v14, %v1579_v44  ;;  %v1428_v61 = vpop.f32.mrf.mxu1  ;;  %v1269_v62 = vpop.f32.mrf.mxu0  ;;  %v1665_v25 = vmin.f32 %v1649_v7, %v1600_v8  ;;  %v1601_v3 = vsub.f32 %v3375_v22, %v3730_v43  ;;  %v1614_v15 = vsub.f32 %v3345_v20, %v3731_v34  ;;  %v3733_v14 = vld [vmem:[#allocation31_spill] sm:$0xff] }
 0x18b   : > { %v1588_v4 = vsub.f32 %v3397_v35, %v1428_v61  ;;  %v1773_v5 = vmin.f32 %v1757_v19, %v1741_v51  ;;  %v1695_v33 = vmin.f32 %v1679_v10, %v1586_v24  ;;  %v1587_v52 = vsub.f32 %v3395_v2, %v1269_v62  ;;  %v3735_v51 = vld [vmem:[#allocation29_spill] sm:$0xff] }
 0x18c   : > { %v1726_v45 = vmin.f32 %v1710_v54, %v1580_v40  ;;  %v1430_v58 = vpop.f32.mrf.mxu1  ;;  %v1273_v49 = vpop.f32.mrf.mxu0  ;;  %v1666_v13 = vmin.f32 %v1650_v18, %v1608_v6  ;;  %v1651_v40 = vmin.f32 %v1614_v15, %v1615_v16  ;;  %v1616_v53 = vsub.f32 %v3353_v27, %v3732_v41  ;;  %v3737_v18 = vld [vmem:[#allocation35_spill] sm:$0xff] }
 0x18d   : > { %1789 = vst [vmem:[#allocation2 + $0x48] sm:$0xff] %v1773_v5  ;;  %v1711_v59 = vmin.f32 %v1695_v33, %v1587_v52  ;;  %v1594_v37 = vsub.f32 %v3385_v36, %v1273_v49  ;;  %v1589_v12 = vsub.f32 %v3406_v56, %v1430_v58  ;;  %v1623_v44 = vsub.f32 %v3339_v11, %v3733_v14  ;;  %v3736_v33 = vld [vmem:[#allocation30_spill] sm:$0xff]  ;;  %v1760_v58 = vld [vmem:[#allocation2 + $0x10] sm:$0xff]  ;;  %v3738_v49 = vld [vmem:[#allocation28_spill] sm:$0xff] }
 0x18e   : > { %v1742_v55 = vmin.f32 %v1726_v45, %v1581_v21  ;;  %v1434_v1 = vpop.f32.mrf.mxu1  ;;  %v1275_v29 = vpop.f32.mrf.mxu0  ;;  %v1681_v38 = vmin.f32 %v1665_v25, %v1601_v3  ;;  %v1609_v7 = vsub.f32 %v3375_v22, %v3734_v46  ;;  %v1622_v54 = vsub.f32 %v3345_v20, %v3735_v51  ;;  %v1762_v46 = vld [vmem:[#allocation2 + $0x60] sm:$0xff] }
 0x18f   : > { %v1596_v30 = vsub.f32 %v3397_v35, %v1434_v1  ;;  %v1727_v32 = vmin.f32 %v1711_v59, %v1588_v4  ;;  %v1696_v47 = vmin.f32 %v1680_v39, %v1594_v37  ;;  %v1595_v57 = vsub.f32 %v3395_v2, %v1275_v29 }
 0x190   : > { %v1774_v28 = vmin.f32 %v1758_v17, %v1742_v55  ;;  %v1436_v63 = vpop.f32.mrf.mxu1  ;;  %v1279_v10 = vpop.f32.mrf.mxu0  ;;  %v1682_v4 = vmin.f32 %v1666_v13, %v1609_v7  ;;  %v1667_v5 = vmin.f32 %v1651_v40, %v1616_v53  ;;  %v1652_v45 = vmin.f32 %v1622_v54, %v1623_v44  ;;  %v3739_v55 = vld [vmem:[#allocation33_spill] sm:$0xff]  ;;  %v3741_v53 = vld [vmem:[#allocation32_spill] sm:$0xff] }
 0x191   : > { %v1743_v8 = vmin.f32 %v1727_v32, %v1589_v12  ;;  %v1712_v9 = vmin.f32 %v1696_v47, %v1595_v57  ;;  %v1602_v0 = vsub.f32 %v3385_v36, %v1279_v10  ;;  %v1597_v24 = vsub.f32 %v3406_v56, %v1436_v63  ;;  %v1761_v47 = vld [vmem:[#allocation2 + $0x38] sm:$0xff] }
 0x192   : > { %1790 = vst [vmem:[#allocation2 + $0x40] sm:$0xff] %v1774_v28  ;;  %v1440_v19 = vpop.f32.mrf.mxu1  ;;  %v1281_v61 = vpop.f32.mrf.mxu0  ;;  %v1624_v52 = vsub.f32 %v3353_v27, %v3736_v33  ;;  %v1631_v26 = vsub.f32 %v3339_v11, %v3737_v18  ;;  %v1617_v25 = vsub.f32 %v3375_v22, %v3738_v49  ;;  %v1630_v59 = vsub.f32 %v3345_v20, %v3739_v55  ;;  %v3740_v28 = vld [vmem:[#allocation34_spill] sm:$0xff] }
 0x193   : > { %v1604_v23 = vsub.f32 %v3397_v35, %v1440_v19  ;;  %v1775_v60 = vmin.f32 %v1759_v50, %v1743_v8  ;;  %v1728_v42 = vmin.f32 %v1712_v9, %v1596_v30  ;;  %v1697_v48 = vmin.f32 %v1681_v38, %v1602_v0 }
 0x194   : > { %v1603_v21 = vsub.f32 %v3395_v2, %v1281_v61  ;;  %v1442_v62 = vpop.f32.mrf.mxu1  ;;  %v1285_v39 = vpop.f32.mrf.mxu0  ;;  %v1683_v29 = vmin.f32 %v1667_v5, %v1617_v25  ;;  %v1668_v30 = vmin.f32 %v1652_v45, %v1624_v52  ;;  %v1632_v32 = vsub.f32 %v3353_v27, %v3740_v28 }
 0x195   : > { %1791 = vst [vmem:[#allocation2 + $0x20] sm:$0xff] %v1775_v60  ;;  %v1744_v6 = vmin.f32 %v1728_v42, %v1597_v24  ;;  %v1610_v16 = vsub.f32 %v3385_v36, %v1285_v39  ;;  %v1605_v37 = vsub.f32 %v3406_v56, %v1442_v62  ;;  %v1653_v63 = vmin.f32 %v1630_v59, %v1631_v26  ;;  %v3742_v60 = vld [vmem:[#allocation36_spill] sm:$0xff] }
 0x196   : > { %v1713_v31 = vmin.f32 %v1697_v48, %v1603_v21  ;;  %v1446_v17 = vpop.f32.mrf.mxu1  ;;  %v1287_v1 = vpop.f32.mrf.mxu0  ;;  %v1625_v14 = vsub.f32 %v3375_v22, %v3741_v53  ;;  %v1633_v42 = vsub.f32 %v3375_v22, %v3742_v60 }
 0x197   : > { %v1612_v43 = vsub.f32 %v3397_v35, %v1446_v17  ;;  %v1776_v3 = vmin.f32 %v1760_v58, %v1744_v6  ;;  %v1698_v11 = vmin.f32 %v1682_v4, %v1610_v16  ;;  %v1611_v15 = vsub.f32 %v3395_v2, %v1287_v1  ;;  %v1763_v58 = vld [vmem:[#allocation2 + $0x70] sm:$0xff]  ;;  %v1764_v1 = vld [vmem:[#allocation2 + $0x78] sm:$0xff] }
 0x198   : > { %v1729_v34 = vmin.f32 %v1713_v31, %v1604_v23  ;;  %v1448_v12 = vpop.f32.mrf.mxu1  ;;  %v1291_v57 = vpop.f32.mrf.mxu0  ;;  %v1684_v19 = vmin.f32 %v1668_v30, %v1625_v14  ;;  %v1669_v51 = vmin.f32 %v1653_v63, %v1632_v32 }
 0x199   : > { %1792 = vst [vmem:[#allocation2 + $0x10] sm:$0xff] %v1776_v3  ;;  %v1714_v13 = vmin.f32 %v1698_v11, %v1611_v15  ;;  %v1618_v40 = vsub.f32 %v3385_v36, %v1291_v57  ;;  %v1613_v44 = vsub.f32 %v3406_v56, %v1448_v12  ;;  %v1765_v12 = vld [vmem:[#allocation2 + $0x28] sm:$0xff] }
 0x19a   : > { %v1745_v20 = vmin.f32 %v1729_v34, %v1605_v37  ;;  %v1452_v41 = vpop.f32.mrf.mxu1  ;;  %v1293_v50 = vpop.f32.mrf.mxu0  ;;  %v1685_v18 = vmin.f32 %v1669_v51, %v1633_v42 }
 0x19b   : > { %v1620_v10 = vsub.f32 %v3397_v35, %v1452_v41  ;;  %v1730_v8 = vmin.f32 %v1714_v13, %v1612_v43  ;;  %v1699_v27 = vmin.f32 %v1683_v29, %v1618_v40  ;;  %v1619_v9 = vsub.f32 %v3395_v2, %v1293_v50 }
 0x19c   : > { %v1777_v38 = vmin.f32 %v1761_v47, %v1745_v20  ;;  %v1454_v0 = vpop.f32.mrf.mxu1  ;;  %v1297_v7 = vpop.f32.mrf.mxu0 }
 0x19d   : > { %v1746_v54 = vmin.f32 %v1730_v8, %v1613_v44  ;;  %v1715_v24 = vmin.f32 %v1699_v27, %v1619_v9  ;;  %v1626_v61 = vsub.f32 %v3385_v36, %v1297_v7  ;;  %v1621_v48 = vsub.f32 %v3406_v56, %v1454_v0 }
 0x19e   : > { %1793 = vst [vmem:[#allocation2 + $0x38] sm:$0xff] %v1777_v38  ;;  %v1458_v23 = vpop.f32.mrf.mxu1  ;;  %v1299_v21 = vpop.f32.mrf.mxu0 }
 0x19f   : > { %v1628_v62 = vsub.f32 %v3397_v35, %v1458_v23  ;;  %v1778_v4 = vmin.f32 %v1762_v46, %v1746_v54  ;;  %v1731_v5 = vmin.f32 %v1715_v24, %v1620_v10  ;;  %v1700_v45 = vmin.f32 %v1684_v19, %v1626_v61 }
 0x1a0   : > { %v1627_v33 = vsub.f32 %v3395_v2, %v1299_v21  ;;  %v1460_v52 = vpop.f32.mrf.mxu1  ;;  %v1303_v39 = vpop.f32.mrf.mxu0 }
 0x1a1   : > { %1794 = vst [vmem:[#allocation2 + $0x60] sm:$0xff] %v1778_v4  ;;  %v1747_v26 = vmin.f32 %v1731_v5, %v1621_v48  ;;  %v1634_v31 = vsub.f32 %v3385_v36, %v1303_v39  ;;  %v1629_v16 = vsub.f32 %v3406_v56, %v1460_v52 }
 0x1a2   : > { %v1716_v6 = vmin.f32 %v1700_v45, %v1627_v33  ;;  %v1464_v22 = vpop.f32.mrf.mxu1  ;;  %v1305_v17 = vpop.f32.mrf.mxu0 }
 0x1a3   : > { %v1636_v49 = vsub.f32 %v3397_v35, %v1464_v22  ;;  %v1779_v25 = vmin.f32 %v1763_v58, %v1747_v26  ;;  %v1701_v59 = vmin.f32 %v1685_v18, %v1634_v31  ;;  %v1635_v37 = vsub.f32 %v3395_v2, %v1305_v17 }
 0x1a4   : > { %v1732_v55 = vmin.f32 %v1716_v6, %v1628_v62  ;;  %v1466_v43 = vpop.f32.mrf.mxu1 }
 0x1a5   : > { %1795 = vst [vmem:[#allocation2 + $0x70] sm:$0xff] %v1779_v25  ;;  %v1717_v34 = vmin.f32 %v1701_v59, %v1635_v37  ;;  %v1637_v36 = vsub.f32 %v3406_v56, %v1466_v43 }
 0x1a6   : > { %v1748_v3 = vmin.f32 %v1732_v55, %v1629_v16 }
 0x1a7   : > { %v1733_v15 = vmin.f32 %v1717_v34, %v1636_v49 }
 0x1a8   : > { %v1780_v11 = vmin.f32 %v1764_v1, %v1748_v3 }
 0x1a9   : > { %v1749_v29 = vmin.f32 %v1733_v15, %v1637_v36  ;;  %1801 = sbr.rel (%p2257_p9) target bundleno = 635 (0x27b), region = 40 }
 0x1aa   : > { %1796 = vst [vmem:[#allocation2 + $0x78] sm:$0xff] %v1780_v11 }
 0x1ab   : > { %v1781_v30 = vmin.f32 %v1765_v12, %v1749_v29 }
 0x1ad   : > { %1797 = vst [vmem:[#allocation2 + $0x28] sm:$0xff] %v1781_v30 }
 0x1ae   : > { %v3743_v35 = vld [vmem:[#allocation5_spill] sm:$0xff]  ;;  %v3744_v28 = vld [vmem:[#allocation3_spill] sm:$0xff]  ;;  %v3745_v47 = vld [vmem:[#allocation6_spill] sm:$0xff]  ;;  %vm1946_vm1 = vcmask 7168  }
 0x1af   : > { %v1804_v2 = vmul.f32 %v3743_v35, %v3743_v35  ;;  %v1802_v32 = vmul.f32 %v3744_v28, %v3744_v28  ;;  %v1805_v57 = vmul.f32 %v3745_v47, %v3745_v47  ;;  %v3746_v63 = vld [vmem:[#allocation4_spill] sm:$0xff]  ;;  %v3748_v44 = vld [vmem:[#allocation7_spill] sm:$0xff]  ;;  %v3749_v8 = vld [vmem:[#allocation10_spill] sm:$0xff] }
 0x1b0   : > { %v1803_v56 = vmul.f32 %v3746_v63, %v3746_v63  ;;  %v3747_v53 = vld [vmem:[#allocation8_spill] sm:$0xff]  ;;  %v1806_v50 = vmul.f32 %v3748_v44, %v3748_v44  ;;  %v1809_v27 = vmul.f32 %v3749_v8, %v3749_v8  ;;  %v3750_v9 = vld [vmem:[#allocation9_spill] sm:$0xff]  ;;  %v3752_v54 = vld [vmem:[#allocation11_spill] sm:$0xff] }
 0x1b1   : > { %v1824_v20 = vsel %vm392_vm0, %v1804_v2, 0.0  ;;  %v1818_v13 = vsel %vm392_vm0, %v1802_v32, 0.0  ;;  %v1827_v40 = vsel %vm392_vm0, %v1805_v57, 0.0  ;;  %v1807_v14 = vmul.f32 %v3747_v53, %v3747_v53  ;;  %v3751_v7 = vld [vmem:[#allocation12_spill] sm:$0xff]  ;;  %v3753_v60 = vld [vmem:[#allocation14_spill] sm:$0xff]  ;;  %v3754_v48 = vld [vmem:[#allocation13_spill] sm:$0xff] }
 0x1b2   : > { %1825 = vadd.xlane.f32.xlu1 %v1824_v20  ;;  %1819 = vadd.xlane.f32.xlu0 %v1818_v13  ;;  %v1821_v41 = vsel %vm392_vm0, %v1803_v56, 0.0  ;;  %v1830_v38 = vsel %vm392_vm0, %v1806_v50, 0.0  ;;  %v1808_v0 = vmul.f32 %v3750_v9, %v3750_v9  ;;  %v1839_v19 = vsel %vm392_vm0, %v1809_v27, 0.0  ;;  %v3755_v5 = vld [vmem:[#allocation16_spill] sm:$0xff]  ;;  %v3756_v33 = vld [vmem:[#allocation15_spill] sm:$0xff]  ;;  %v3757_v18 = vld [vmem:[#allocation18_spill] sm:$0xff] }
 0x1b3   : > { %v1833_v10 = vsel %vm392_vm0, %v1807_v14, 0.0  ;;  %v1811_v51 = vmul.f32 %v3751_v7, %v3751_v7  ;;  %v1810_v24 = vmul.f32 %v3752_v54, %v3752_v54  ;;  %v1813_v42 = vmul.f32 %v3753_v60, %v3753_v60  ;;  %v3758_v6 = vld [vmem:[#allocation17_spill] sm:$0xff]  ;;  %v1867_v17 = vld [vmem:[#allocation2] sm:$0xff]  ;;  %v1869_v25 = vld [vmem:[#allocation2 + $0x18] sm:$0xff] }
 0x1b4   : > { %v1836_v46 = vsel %vm392_vm0, %v1808_v0, 0.0  ;;  %v1812_v21 = vmul.f32 %v3754_v48, %v3754_v48  ;;  %v1815_v45 = vmul.f32 %v3755_v5, %v3755_v5  ;;  %v1814_v52 = vmul.f32 %v3756_v33, %v3756_v33  ;;  %v1866_v49 = vld [vmem:[#allocation2 + $0x30] sm:$0xff]  ;;  %v1868_v55 = vld [vmem:[#allocation2 + $0x58] sm:$0xff]  ;;  %v1871_v59 = vld [vmem:[#allocation2 + $0x68] sm:$0xff] }
 0x1b5   : > { %v1845_v61 = vsel %vm392_vm0, %v1811_v51, 0.0  ;;  %v1842_v23 = vsel %vm392_vm0, %v1810_v24, 0.0  ;;  %v1851_v62 = vsel %vm392_vm0, %v1813_v42, 0.0  ;;  %v1817_v26 = vmul.f32 %v3757_v18, %v3757_v18  ;;  %v1870_v37 = vld [vmem:[#allocation2 + $0x50] sm:$0xff]  ;;  %v1873_v1 = vld [vmem:[#allocation2 + $0x48] sm:$0xff]  ;;  %v1875_v3 = vld [vmem:[#allocation2 + $0x20] sm:$0xff] }
 0x1b6   : > { %1828 = vadd.xlane.f32.xlu1 %v1827_v40  ;;  %1822 = vadd.xlane.f32.xlu0 %v1821_v41  ;;  %v1848_v4 = vsel %vm392_vm0, %v1812_v21, 0.0  ;;  %v1857_v58 = vsel %vm392_vm0, %v1815_v45, 0.0  ;;  %v1854_v39 = vsel %vm392_vm0, %v1814_v52, 0.0  ;;  %v1816_v31 = vmul.f32 %v3758_v6, %v3758_v6  ;;  %v1872_v43 = vld [vmem:[#allocation2 + $0x8] sm:$0xff]  ;;  %v1874_v34 = vld [vmem:[#allocation2 + $0x40] sm:$0xff]  ;;  %v1877_v11 = vld [vmem:[#allocation2 + $0x38] sm:$0xff] }
 0x1b7   : > { %v1863_v22 = vsel %vm392_vm0, %v1817_v26, 0.0  ;;  %v1876_v15 = vld [vmem:[#allocation2 + $0x10] sm:$0xff]  ;;  %v1878_v12 = vld [vmem:[#allocation2 + $0x60] sm:$0xff]  ;;  %v1881_v29 = vld [vmem:[#allocation2 + $0x28] sm:$0xff] }
 0x1b8   : > { %v1860_v16 = vsel %vm392_vm0, %v1816_v31, 0.0  ;;  %v1879_v36 = vld [vmem:[#allocation2 + $0x70] sm:$0xff]  ;;  %v1880_v30 = vld [vmem:[#allocation2 + $0x78] sm:$0xff] }
 0x1ba   : > { %1834 = vadd.xlane.f32.xlu1 %v1833_v10  ;;  %1831 = vadd.xlane.f32.xlu0 %v1830_v38 }
 0x1be   : > { %1840 = vadd.xlane.f32.xlu1 %v1839_v19  ;;  %1837 = vadd.xlane.f32.xlu0 %v1836_v46 }
 0x1c2   : > { %1846 = vadd.xlane.f32.xlu1 %v1845_v61  ;;  %1843 = vadd.xlane.f32.xlu0 %v1842_v23 }
 0x1c6   : > { %1852 = vadd.xlane.f32.xlu1 %v1851_v62  ;;  %1849 = vadd.xlane.f32.xlu0 %v1848_v4 }
 0x1ca   : > { %1858 = vadd.xlane.f32.xlu1 %v1857_v58  ;;  %1855 = vadd.xlane.f32.xlu0 %v1854_v39 }
 0x1ce   : > { %1864 = vadd.xlane.f32.xlu1 %v1863_v22  ;;  %1861 = vadd.xlane.f32.xlu0 %v1860_v16 }
 0x1d2   : > { %1884 = vmin.xlane.f32.xlu1 %v1867_v17  ;;  %1882 = vmin.xlane.f32.xlu0 %v1866_v49 }
 0x1d6   : > { %1888 = vmin.xlane.f32.xlu1 %v1869_v25  ;;  %1886 = vmin.xlane.f32.xlu0 %v1868_v55 }
 0x1da   : > { %1892 = vmin.xlane.f32.xlu1 %v1871_v59  ;;  %1890 = vmin.xlane.f32.xlu0 %v1870_v37 }
 0x1de   : > { %1896 = vmin.xlane.f32.xlu1 %v1873_v1  ;;  %1894 = vmin.xlane.f32.xlu0 %v1872_v43 }
 0x1e2   : > { %1900 = vmin.xlane.f32.xlu1 %v1875_v3  ;;  %1898 = vmin.xlane.f32.xlu0 %v1874_v34 }
 0x1e6   : > { %1904 = vmin.xlane.f32.xlu1 %v1877_v11  ;;  %1902 = vmin.xlane.f32.xlu0 %v1876_v15 }
 0x1ea   : > { %1908 = vmin.xlane.f32.xlu1 %v1879_v36  ;;  %1906 = vmin.xlane.f32.xlu0 %v1878_v12 }
 0x1ee   : > { %1912 = vmin.xlane.f32.xlu1 %v1881_v29  ;;  %1910 = vmin.xlane.f32.xlu0 %v1880_v30 }
 0x23b   : > { %v1826_v35 = vpop.xlane.xlu1 %1825  ;;  %v1820_v2 = vpop.xlane.xlu0 %1819 }
 0x23c   : > { %v1914_v10 = vmul.f32 0.5, %v1820_v2  ;;  %v1916_v19 = vmul.f32 0.5, %v1826_v35 }
 0x23f   : > { %v1829_v28 = vpop.xlane.xlu1 %1828  ;;  %v1823_v32 = vpop.xlane.xlu0 %1822 }
 0x240   : > { %v1915_v38 = vmul.f32 0.5, %v1823_v32  ;;  %v1917_v46 = vmul.f32 0.5, %v1829_v28 }
 0x243   : > { %v1835_v47 = vpop.xlane.xlu1 %1834  ;;  %v1832_v57 = vpop.xlane.xlu0 %1831 }
 0x244   : > { %v1919_v61 = vmul.f32 0.5, %v1835_v47  ;;  %v1918_v23 = vmul.f32 0.5, %v1832_v57 }
 0x247   : > { %v1841_v63 = vpop.xlane.xlu1 %1840  ;;  %v1838_v56 = vpop.xlane.xlu0 %1837 }
 0x248   : > { %v1921_v62 = vmul.f32 0.5, %v1841_v63  ;;  %v1920_v4 = vmul.f32 0.5, %v1838_v56 }
 0x24b   : > { %v1847_v20 = vpop.xlane.xlu1 %1846  ;;  %v1844_v13 = vpop.xlane.xlu0 %1843 }
 0x24c   : > { %v1923_v58 = vmul.f32 0.5, %v1847_v20  ;;  %v1922_v39 = vmul.f32 0.5, %v1844_v13 }
 0x24f   : > { %v1853_v40 = vpop.xlane.xlu1 %1852  ;;  %v1850_v41 = vpop.xlane.xlu0 %1849 }
 0x250   : > { %v1925_v22 = vmul.f32 0.5, %v1853_v40  ;;  %v1924_v16 = vmul.f32 0.5, %v1850_v41 }
 0x253   : > { %v1859_v53 = vpop.xlane.xlu1 %1858  ;;  %v1856_v14 = vpop.xlane.xlu0 %1855 }
 0x254   : > { %v1927_v59 = vmul.f32 0.5, %v1859_v53  ;;  %v1926_v37 = vmul.f32 0.5, %v1856_v14 }
 0x257   : > { %v1865_v44 = vpop.xlane.xlu1 %1864  ;;  %v1862_v50 = vpop.xlane.xlu0 %1861 }
 0x258   : > { %v1929_v11 = vmul.f32 0.5, %v1865_v44  ;;  %v1928_v15 = vmul.f32 0.5, %v1862_v50 }
 0x25b   : > { %v1885_v8 = vpop.xlane.xlu1 %1884  ;;  %v1883_v27 = vpop.xlane.xlu0 %1882 }
 0x25c   : > { %v1931_v9 = vadd.f32 %v1915_v38, %v1885_v8  ;;  %v1930_v0 = vadd.f32 %v1914_v10, %v1883_v27 }
 0x25e   : > { %1948 = vst.msk [vmem:[%s2665_s5 + $0x8] sm:$0xff] %vm1946_vm1, %v1931_v9  ;;  %1947 = vst.msk [vmem:[%s2665_s5] sm:$0xff] %vm1946_vm1, %v1930_v0 }
 0x25f   : > { %v1889_v7 = vpop.xlane.xlu1 %1888  ;;  %v1887_v51 = vpop.xlane.xlu0 %1886 }
 0x260   : > { %v1933_v54 = vadd.f32 %v1917_v46, %v1889_v7  ;;  %v1932_v24 = vadd.f32 %v1916_v19, %v1887_v51 }
 0x262   : > { %1950 = vst.msk [vmem:[%s2665_s5 + $0x18] sm:$0xff] %vm1946_vm1, %v1933_v54  ;;  %1949 = vst.msk [vmem:[%s2665_s5 + $0x10] sm:$0xff] %vm1946_vm1, %v1932_v24 }
 0x263   : > { %v1893_v60 = vpop.xlane.xlu1 %1892  ;;  %v1891_v42 = vpop.xlane.xlu0 %1890 }
 0x264   : > { %v1935_v48 = vadd.f32 %v1919_v61, %v1893_v60  ;;  %v1934_v21 = vadd.f32 %v1918_v23, %v1891_v42 }
 0x266   : > { %1952 = vst.msk [vmem:[%s2665_s5 + $0x28] sm:$0xff] %vm1946_vm1, %v1935_v48  ;;  %1951 = vst.msk [vmem:[%s2665_s5 + $0x20] sm:$0xff] %vm1946_vm1, %v1934_v21 }
 0x267   : > { %v1897_v5 = vpop.xlane.xlu1 %1896  ;;  %v1895_v45 = vpop.xlane.xlu0 %1894 }
 0x268   : > { %v1937_v33 = vadd.f32 %v1921_v62, %v1897_v5  ;;  %v1936_v52 = vadd.f32 %v1920_v4, %v1895_v45 }
 0x26a   : > { %1954 = vst.msk [vmem:[%s2665_s5 + $0x38] sm:$0xff] %vm1946_vm1, %v1937_v33  ;;  %1953 = vst.msk [vmem:[%s2665_s5 + $0x30] sm:$0xff] %vm1946_vm1, %v1936_v52 }
 0x26b   : > { %v1901_v18 = vpop.xlane.xlu1 %1900  ;;  %v1899_v26 = vpop.xlane.xlu0 %1898 }
 0x26c   : > { %v1939_v6 = vadd.f32 %v1923_v58, %v1901_v18  ;;  %v1938_v31 = vadd.f32 %v1922_v39, %v1899_v26 }
 0x26e   : > { %1956 = vst.msk [vmem:[%s2665_s5 + $0x48] sm:$0xff] %vm1946_vm1, %v1939_v6  ;;  %1955 = vst.msk [vmem:[%s2665_s5 + $0x40] sm:$0xff] %vm1946_vm1, %v1938_v31 }
 0x26f   : > { %v1905_v17 = vpop.xlane.xlu1 %1904  ;;  %v1903_v49 = vpop.xlane.xlu0 %1902 }
 0x270   : > { %v1941_v25 = vadd.f32 %v1925_v22, %v1905_v17  ;;  %v1940_v55 = vadd.f32 %v1924_v16, %v1903_v49 }
 0x272   : > { %1958 = vst.msk [vmem:[%s2665_s5 + $0x58] sm:$0xff] %vm1946_vm1, %v1941_v25  ;;  %1957 = vst.msk [vmem:[%s2665_s5 + $0x50] sm:$0xff] %vm1946_vm1, %v1940_v55 }
 0x273   : > { %v1909_v1 = vpop.xlane.xlu1 %1908  ;;  %v1907_v43 = vpop.xlane.xlu0 %1906 }
 0x274   : > { %v1943_v3 = vadd.f32 %v1927_v59, %v1909_v1  ;;  %v1942_v34 = vadd.f32 %v1926_v37, %v1907_v43 }
 0x276   : > { %1960 = vst.msk [vmem:[%s2665_s5 + $0x68] sm:$0xff] %vm1946_vm1, %v1943_v3  ;;  %1959 = vst.msk [vmem:[%s2665_s5 + $0x60] sm:$0xff] %vm1946_vm1, %v1942_v34 }
 0x277   : > { %v1913_v36 = vpop.xlane.xlu1 %1912  ;;  %v1911_v12 = vpop.xlane.xlu0 %1910 }
 0x278   : > { %v1945_v29 = vadd.f32 %v1929_v11, %v1913_v36  ;;  %v1944_v30 = vadd.f32 %v1928_v15, %v1911_v12 }
 0x27a   : > { %1962 = vst.msk [vmem:[%s2665_s5 + $0x78] sm:$0xff] %vm1946_vm1, %v1945_v29  ;;  %1961 = vst.msk [vmem:[%s2665_s5 + $0x70] sm:$0xff] %vm1946_vm1, %v1944_v30 }
 0x27b PF: > { %s13_s16 = sadd.s32 1, %s2595_s16   ;;  %s3759_s12 = smov %s2587_s14 }
 0x27c   : > { %p10_p10 = scmp.ge.s32.totalorder %s13_s16, 6   ;;  %s3760_s13 = smov %s2591_s15 }
 0x27d   : > { %s3761_s14 = smov %s3764_s17  ;;  %s3762_s15 = smov %s3768_s18 }
 0x27e   :  { %12 = sbr.rel (!%p10_p10) target bundleno = 3 (0x3), region = 76 }

</bundles_post_ra>
